<compile_context>
chip_gen: v7x
topology: tpu7x:2x2x1
jax: 0.10.0
libtpu: 0.0.40
codegen_flags: <defaults>
</compile_context>

<pallas_src>
import numpy as np
import jax
import jax.numpy as jnp
from jax.experimental import pallas as pl
from jax.experimental.pallas import tpu as pltpu  # noqa: F401

NEG_SLOPE = 0.01  # nn.LeakyReLU default


def _leaky_relu(x):
    return jnp.where(x > 0, x, NEG_SLOPE * x)


def _round_up(n, m=8):
    return ((n + m - 1) // m) * m


# ---------------------------------------------------------------------------
# Kernel factory: whole forward fused in a single gridless pallas_call.
# `layout` / `cliques` are static Python structures -> fully specialized.
# ---------------------------------------------------------------------------
def make_fused_kernel(B, N, H, layout, cliques):
    BN = B * N
    n_sage = 3

    def _linear(w_ref, rec, x, activate):
        # Lazy weight read: slice the packed slab at the point of use.
        w_off, fi, fo, b_off = rec
        y = jnp.dot(x, w_ref[w_off:w_off + fi, :fo],
                    preferred_element_type=jnp.float32)
        if b_off is not None:
            y = y + w_ref[b_off:b_off + 1, :fo]
        return _leaky_relu(y) if activate else y

    def kernel(act_ref, w_ref, out_ref):
        a_bd = act_ref[:, 0:BN]                    # (BN, BN) block-diag agg
        x = act_ref[:, BN:BN + 1]                  # (BN, 1) node values

        # node_embedding: Linear(1,H) -> LeakyReLU -> Linear(H,H) -> LeakyReLU
        w_off, _, fo, b_off = layout['emb0']
        h = _leaky_relu(x * w_ref[w_off:w_off + 1, :fo]
                        + w_ref[b_off:b_off + 1, :fo])        # (BN, H)
        h = _linear(w_ref, layout['emb1'], h, activate=True)
        h_orig = h

        # 3x SAGEConv(mean): leaky(lin_l(A_bd @ h) + lin_r(h)); resid after L0
        for i in range(n_sage):
            rec_l, rec_r = layout['sage'][i]
            agg = jnp.dot(a_bd, h, preferred_element_type=jnp.float32)
            z = (_linear(w_ref, rec_l, agg, activate=False)
                 + _linear(w_ref, rec_r, h, activate=False))
            h = _leaky_relu(z)
            if i == 0:
                h = h + h_orig
            # TODO(synk): F.dropout(p=0.1) applies only in training mode; this
            # is the inference path, so dropout is skipped.

        # node_out: Linear -> LeakyReLU -> Linear
        h = _linear(w_ref, layout['out0'], h, activate=True)
        h = _linear(w_ref, layout['out1'], h, activate=False)  # (BN, H)

        # Clique gathers via one selection matmul. Block p of Sel (rows
        # 8p..8p+B-1) picks node clique[j][k] for every batch element; the
        # remaining rows of each block are zero -> 8-aligned static slices.
        sel_off, sel_rows, sel_cols = layout['sel']
        G = jnp.dot(w_ref[sel_off:sel_off + sel_rows, :sel_cols], h,
                    preferred_element_type=jnp.float32)        # (8*P, H)

        energies = []
        p = 0
        for j, clique in enumerate(cliques):
            cs = len(clique)
            recs = layout['cliques'][j]
            w_off, _, fo, b_off = recs[0]          # first Linear(cs*H, d0)
            e = w_ref[b_off:b_off + 1, :fo]        # start from bias
            for k in range(cs):
                gk = G[8 * (p + k):8 * (p + k) + 8, :]               # (8, H)
                wk = w_ref[w_off + k * H:w_off + (k + 1) * H, :fo]   # (H, d0)
                e = e + jnp.dot(gk, wk, preferred_element_type=jnp.float32)
            p += cs
            for rec in recs[1:]:
                e = _linear(w_ref, rec, _leaky_relu(e), activate=False)
            energies.append(e)                     # (8, 1); rows >= B unused

        out = jnp.concatenate(energies, axis=1)    # (8, num_cliques)
        out_ref[...] = out[:B, :]

    return kernel


# ---------------------------------------------------------------------------
# Parameter init (PyTorch nn.Linear-style shapes: W (fan_in, fan_out), b (fo,))
# ---------------------------------------------------------------------------
def _init_linear(key, fan_in, fan_out, bias=True):
    kw, kb = jax.random.split(key)
    scale = 1.0 / np.sqrt(fan_in)
    w = jax.random.uniform(kw, (fan_in, fan_out), jnp.float32, -scale, scale)
    if not bias:
        return w, None
    b = jax.random.uniform(kb, (fan_out,), jnp.float32, -scale, scale)
    return w, b


def init_params(key, cliques, hidden_dim, energy_dim):
    H, E = hidden_dim, energy_dim
    keys = jax.random.split(key, 64)
    k = iter(keys)
    gnn = {}
    gnn['w0'], gnn['b0'] = _init_linear(next(k), 1, H)
    gnn['w1'], gnn['b1'] = _init_linear(next(k), H, H)
    for i in range(3):
        gnn[f'wl{i}'], gnn[f'bl{i}'] = _init_linear(next(k), H, H)       # lin_l
        gnn[f'wr{i}'], _ = _init_linear(next(k), H, H, bias=False)       # lin_r
    gnn['wo0'], gnn['bo0'] = _init_linear(next(k), H, H)
    gnn['wo1'], gnn['bo1'] = _init_linear(next(k), H, H)

    clique_params = []
    for clique in cliques:
        cs = len(clique)
        in_dim = cs * H
        dims = ([in_dim, E * 2, E, E // 2, 1] if cs >= 4
                else [in_dim, E, E // 2, 1])
        layers = [_init_linear(next(k), a, b) for a, b in zip(dims[:-1], dims[1:])]
        clique_params.append(layers)
    return {'gnn': gnn, 'cliques': clique_params}


# ---------------------------------------------------------------------------
# Pack every weight / bias / selection matrix into ONE f32 slab (row-blocks at
# 8-aligned offsets, lane width = max fan_out). Returns slab + static layout.
# ---------------------------------------------------------------------------
def pack_weight_slab(params, cliques, B, N, H):
    BN = B * N
    gnn = params['gnn']

    widths = [gnn['w0'].shape[1], gnn['w1'].shape[1],
              gnn['wo0'].shape[1], gnn['wo1'].shape[1], BN]
    for i in range(3):
        widths += [gnn[f'wl{i}'].shape[1], gnn[f'wr{i}'].shape[1]]
    for layers in params['cliques']:
        widths += [w.shape[1] for (w, _) in layers]
    width = max(widths)

    blocks, layout = [], {}
    off = 0

    def add_block(w, b):
        nonlocal off
        fi, fo = w.shape
        nrows = _round_up(fi + (1 if b is not None else 0), 8)
        blk = jnp.zeros((nrows, width), jnp.float32)
        blk = blk.at[:fi, :fo].set(w.astype(jnp.float32))
        b_off = None
        if b is not None:
            blk = blk.at[fi, :fo].set(b.astype(jnp.float32))
            b_off = off + fi
        blocks.append(blk)
        rec = (off, fi, fo, b_off)
        off += nrows
        return rec

    layout['emb0'] = add_block(gnn['w0'], gnn['b0'])
    layout['emb1'] = add_block(gnn['w1'], gnn['b1'])
    layout['sage'] = []
    for i in range(3):
        rec_l = add_block(gnn[f'wl{i}'], gnn[f'bl{i}'])
        rec_r = add_block(gnn[f'wr{i}'], None)
        layout['sage'].append((rec_l, rec_r))
    layout['out0'] = add_block(gnn['wo0'], gnn['bo0'])
    layout['out1'] = add_block(gnn['wo1'], gnn['bo1'])
    layout['cliques'] = []
    for layers in params['cliques']:
        layout['cliques'].append([add_block(w, b) for (w, b) in layers])

    # Selection matrix: P = total clique positions, 8 rows per (clique, pos)
    # block so every slice of Sel @ h is tile-aligned.
    P = sum(len(c) for c in cliques)
    sel = np.zeros((8 * P, BN), np.float32)
    p = 0
    for clique in cliques:
        for idx in clique:
            for b in range(B):
                sel[8 * p + b, b * N + idx] = 1.0
            p += 1
    sel_blk = jnp.zeros((8 * P, width), jnp.float32).at[:, :BN].set(
        jnp.asarray(sel))
    layout['sel'] = (off, 8 * P, BN)
    blocks.append(sel_blk)
    off += 8 * P

    return jnp.concatenate(blocks, axis=0), layout


# ---------------------------------------------------------------------------
# Full UGMPotentialModel forward (single fused Pallas kernel).
# ---------------------------------------------------------------------------
def ugm_potential_forward(x, edge_index, params, cliques, num_nodes, hidden_dim):
    B = x.shape[0]
    N = num_nodes
    H = hidden_dim
    BN = B * N

    # PyG SAGEConv scatter-mean matrix (empty neighborhood -> 0). The PyTorch
    # model replicates an identical edge_index per batch element, so the
    # batched adjacency is block-diagonal with identical blocks.
    src, dst = edge_index[0], edge_index[1]
    A = jnp.zeros((N, N), jnp.float32).at[dst, src].add(1.0)
    deg = jnp.sum(A, axis=1, keepdims=True)
    A_norm = A / jnp.maximum(deg, 1.0)
    A_bd = jnp.kron(jnp.eye(B, dtype=jnp.float32), A_norm)       # (BN, BN)

    # Packed activation-side input: [A_bd | x]  -> a single lane-dense DMA.
    act_slab = jnp.concatenate(
        [A_bd, x.reshape(BN, 1).astype(jnp.float32)], axis=1)    # (BN, BN+1)

    w_slab, layout = pack_weight_slab(params, cliques, B, N, H)

    kernel = make_fused_kernel(B, N, H, layout, [tuple(c) for c in cliques])

    energies = pl.pallas_call(
        kernel,
        out_shape=jax.ShapeDtypeStruct((B, len(cliques)), jnp.float32),
    )(act_slab, w_slab)                                          # (B, n_cliques)

    total_energy = jnp.sum(energies, axis=1)                     # (B,)
    all_energies = [energies[:, j:j + 1] for j in range(len(cliques))]
    return total_energy, all_energies


# ---------------------------------------------------------------------------
# Pure-JAX reference (mirrors the PyTorch forward) for correctness checking.
# ---------------------------------------------------------------------------
def ugm_reference(x, edge_index, params, cliques, num_nodes, hidden_dim):
    B, N, H = x.shape[0], num_nodes, hidden_dim
    src, dst = edge_index[0], edge_index[1]
    A = jnp.zeros((N, N), jnp.float32).at[dst, src].add(1.0)
    deg = jnp.sum(A, axis=1, keepdims=True)
    A_norm = A / jnp.maximum(deg, 1.0)

    gnn = params['gnn']
    h = x.reshape(B * N, 1).astype(jnp.float32)
    h = _leaky_relu(h @ gnn['w0'] + gnn['b0'])
    h = _leaky_relu(h @ gnn['w1'] + gnn['b1'])
    h_orig = h
    for i in range(3):
        agg = jnp.einsum('ij,bjh->bih', A_norm,
                         h.reshape(B, N, H)).reshape(B * N, H)
        z = agg @ gnn[f'wl{i}'] + gnn[f'bl{i}'] + h @ gnn[f'wr{i}']
        h = _leaky_relu(z)
        if i == 0:
            h = h + h_orig
    h = _leaky_relu(h @ gnn['wo0'] + gnn['bo0'])
    h = h @ gnn['wo1'] + gnn['bo1']
    node_emb = h.reshape(B, N, H)

    all_e = []
    for j, clique in enumerate(cliques):
        e = jnp.concatenate([node_emb[:, idx, :] for idx in clique], axis=-1)
        layers = params['cliques'][j]
        for li, (w, b) in enumerate(layers):
            e = e @ w + b
            if li < len(layers) - 1:
                e = _leaky_relu(e)
        all_e.append(e)
    stacked = jnp.concatenate(all_e, axis=1)
    return jnp.sum(stacked, axis=1), all_e


if __name__ == "__main__":
    B, N, H, E_dim = 2, 16, 32, 32
    cliques = [[0, 1, 2], [4, 5, 6, 7], [8, 9]]

    key = jax.random.PRNGKey(0)
    k_param, k_x = jax.random.split(key)
    params = init_params(k_param, cliques, H, E_dim)

    # Bidirectional ring graph over N nodes: [2, 2N] edge index.
    src = list(range(N)) + [(i + 1) % N for i in range(N)]
    dst = [(i + 1) % N for i in range(N)] + list(range(N))
    edge_index = jnp.array([src, dst], dtype=jnp.int32)

    x = jax.random.normal(k_x, (B, N), jnp.float32)

    total_energy, clique_energies = ugm_potential_forward(
        x, edge_index, params, cliques, N, H)
    total_energy = jax.block_until_ready(total_energy)
    for e in clique_energies:
        jax.block_until_ready(e)

    assert total_energy.shape == (B,)
    assert all(e.shape == (B, 1) for e in clique_energies)

    ref_total, ref_cliques = ugm_reference(x, edge_index, params, cliques, N, H)
    assert jnp.allclose(total_energy, ref_total, rtol=1e-3, atol=1e-3)
    for e, r in zip(clique_energies, ref_cliques):
        assert jnp.allclose(e, r, rtol=1e-3, atol=1e-3)

    print("KERNEL_OK")
</pallas_src>

<mosaic_0001>
module attributes {stable_mosaic.version = 11 : i64} {
  func.func @kernel(%arg0: memref<32x33xf32, #tpu.memory_space<vmem>>, %arg1: memref<992x64xf32, #tpu.memory_space<vmem>>, %arg2: memref<2x3xf32, #tpu.memory_space<vmem>>) attributes {dimension_semantics = [], scalar_prefetch = 0 : i64, scratch_operands = 0 : i64, tpu.core_type = #tpu.core_type<tc>} {
    %c0 = arith.constant 0 : index
    %c0_0 = arith.constant 0 : index
    %0 = vector.load %arg0[%c0, %c0_0] : memref<32x33xf32, #tpu.memory_space<vmem>>, vector<32x32xf32>
    %c0_1 = arith.constant 0 : index
    %c32 = arith.constant 32 : index
    %1 = vector.load %arg0[%c0_1, %c32] : memref<32x33xf32, #tpu.memory_space<vmem>>, vector<32x1xf32>
    %c0_2 = arith.constant 0 : index
    %c0_3 = arith.constant 0 : index
    %2 = vector.load %arg1[%c0_2, %c0_3] : memref<992x64xf32, #tpu.memory_space<vmem>>, vector<1x32xf32>
    %3 = vector.broadcast %1 : vector<32x1xf32> to vector<32x32xf32>
    %4 = vector.broadcast %2 : vector<1x32xf32> to vector<32x32xf32>
    %5 = arith.mulf %3, %4 : vector<32x32xf32>
    %c1 = arith.constant 1 : index
    %c0_4 = arith.constant 0 : index
    %6 = vector.load %arg1[%c1, %c0_4] : memref<992x64xf32, #tpu.memory_space<vmem>>, vector<1x32xf32>
    %7 = vector.broadcast %6 : vector<1x32xf32> to vector<32x32xf32>
    %8 = arith.addf %5, %7 : vector<32x32xf32>
    %cst = arith.constant 0.000000e+00 : f32
    %9 = vector.broadcast %cst : f32 to vector<32x32xf32>
    %10 = arith.cmpf ogt, %8, %9 : vector<32x32xf32>
    %cst_5 = arith.constant 0.00999999977 : f32
    %11 = vector.broadcast %cst_5 : f32 to vector<32x32xf32>
    %12 = arith.mulf %11, %8 : vector<32x32xf32>
    %13 = arith.select %10, %8, %12 : vector<32x32xi1>, vector<32x32xf32>
    %c8 = arith.constant 8 : index
    %c0_6 = arith.constant 0 : index
    %14 = vector.load %arg1[%c8, %c0_6] : memref<992x64xf32, #tpu.memory_space<vmem>>, vector<32x32xf32>
    %cst_7 = arith.constant dense<0.000000e+00> : vector<32x32xf32>
    %15 = tpu.matmul %13, %14, %cst_7 {dimension_numbers = #tpu.dot_dimension_numbers<[1], [0], [0], [1], [0, 0, 1, 1], [], []>} : vector<32x32xf32>, vector<32x32xf32>, vector<32x32xf32> -> vector<32x32xf32>
    %c40 = arith.constant 40 : index
    %c0_8 = arith.constant 0 : index
    %16 = vector.load %arg1[%c40, %c0_8] : memref<992x64xf32, #tpu.memory_space<vmem>>, vector<1x32xf32>
    %17 = vector.broadcast %16 : vector<1x32xf32> to vector<32x32xf32>
    %18 = arith.addf %15, %17 : vector<32x32xf32>
    %cst_9 = arith.constant 0.000000e+00 : f32
    %19 = vector.broadcast %cst_9 : f32 to vector<32x32xf32>
    %20 = arith.cmpf ogt, %18, %19 : vector<32x32xf32>
    %cst_10 = arith.constant 0.00999999977 : f32
    %21 = vector.broadcast %cst_10 : f32 to vector<32x32xf32>
    %22 = arith.mulf %21, %18 : vector<32x32xf32>
    %23 = arith.select %20, %18, %22 : vector<32x32xi1>, vector<32x32xf32>
    %cst_11 = arith.constant dense<0.000000e+00> : vector<32x32xf32>
    %24 = tpu.matmul %0, %23, %cst_11 {dimension_numbers = #tpu.dot_dimension_numbers<[1], [0], [0], [1], [0, 0, 1, 1], [], []>} : vector<32x32xf32>, vector<32x32xf32>, vector<32x32xf32> -> vector<32x32xf32>
    %c48 = arith.constant 48 : index
    %c0_12 = arith.constant 0 : index
    %25 = vector.load %arg1[%c48, %c0_12] : memref<992x64xf32, #tpu.memory_space<vmem>>, vector<32x32xf32>
    %cst_13 = arith.constant dense<0.000000e+00> : vector<32x32xf32>
    %26 = tpu.matmul %24, %25, %cst_13 {dimension_numbers = #tpu.dot_dimension_numbers<[1], [0], [0], [1], [0, 0, 1, 1], [], []>} : vector<32x32xf32>, vector<32x32xf32>, vector<32x32xf32> -> vector<32x32xf32>
    %c80 = arith.constant 80 : index
    %c0_14 = arith.constant 0 : index
    %27 = vector.load %arg1[%c80, %c0_14] : memref<992x64xf32, #tpu.memory_space<vmem>>, vector<1x32xf32>
    %28 = vector.broadcast %27 : vector<1x32xf32> to vector<32x32xf32>
    %29 = arith.addf %26, %28 : vector<32x32xf32>
    %c88 = arith.constant 88 : index
    %c0_15 = arith.constant 0 : index
    %30 = vector.load %arg1[%c88, %c0_15] : memref<992x64xf32, #tpu.memory_space<vmem>>, vector<32x32xf32>
    %cst_16 = arith.constant dense<0.000000e+00> : vector<32x32xf32>
    %31 = tpu.matmul %23, %30, %cst_16 {dimension_numbers = #tpu.dot_dimension_numbers<[1], [0], [0], [1], [0, 0, 1, 1], [], []>} : vector<32x32xf32>, vector<32x32xf32>, vector<32x32xf32> -> vector<32x32xf32>
    %32 = arith.addf %29, %31 : vector<32x32xf32>
    %cst_17 = arith.constant 0.000000e+00 : f32
    %33 = vector.broadcast %cst_17 : f32 to vector<32x32xf32>
    %34 = arith.cmpf ogt, %32, %33 : vector<32x32xf32>
    %cst_18 = arith.constant 0.00999999977 : f32
    %35 = vector.broadcast %cst_18 : f32 to vector<32x32xf32>
    %36 = arith.mulf %35, %32 : vector<32x32xf32>
    %37 = arith.select %34, %32, %36 : vector<32x32xi1>, vector<32x32xf32>
    %38 = arith.addf %37, %23 : vector<32x32xf32>
    %cst_19 = arith.constant dense<0.000000e+00> : vector<32x32xf32>
    %39 = tpu.matmul %0, %38, %cst_19 {dimension_numbers = #tpu.dot_dimension_numbers<[1], [0], [0], [1], [0, 0, 1, 1], [], []>} : vector<32x32xf32>, vector<32x32xf32>, vector<32x32xf32> -> vector<32x32xf32>
    %c120 = arith.constant 120 : index
    %c0_20 = arith.constant 0 : index
    %40 = vector.load %arg1[%c120, %c0_20] : memref<992x64xf32, #tpu.memory_space<vmem>>, vector<32x32xf32>
    %cst_21 = arith.constant dense<0.000000e+00> : vector<32x32xf32>
    %41 = tpu.matmul %39, %40, %cst_21 {dimension_numbers = #tpu.dot_dimension_numbers<[1], [0], [0], [1], [0, 0, 1, 1], [], []>} : vector<32x32xf32>, vector<32x32xf32>, vector<32x32xf32> -> vector<32x32xf32>
    %c152 = arith.constant 152 : index
    %c0_22 = arith.constant 0 : index
    %42 = vector.load %arg1[%c152, %c0_22] : memref<992x64xf32, #tpu.memory_space<vmem>>, vector<1x32xf32>
    %43 = vector.broadcast %42 : vector<1x32xf32> to vector<32x32xf32>
    %44 = arith.addf %41, %43 : vector<32x32xf32>
    %c160 = arith.constant 160 : index
    %c0_23 = arith.constant 0 : index
    %45 = vector.load %arg1[%c160, %c0_23] : memref<992x64xf32, #tpu.memory_space<vmem>>, vector<32x32xf32>
    %cst_24 = arith.constant dense<0.000000e+00> : vector<32x32xf32>
    %46 = tpu.matmul %38, %45, %cst_24 {dimension_numbers = #tpu.dot_dimension_numbers<[1], [0], [0], [1], [0, 0, 1, 1], [], []>} : vector<32x32xf32>, vector<32x32xf32>, vector<32x32xf32> -> vector<32x32xf32>
    %47 = arith.addf %44, %46 : vector<32x32xf32>
    %cst_25 = arith.constant 0.000000e+00 : f32
    %48 = vector.broadcast %cst_25 : f32 to vector<32x32xf32>
    %49 = arith.cmpf ogt, %47, %48 : vector<32x32xf32>
    %cst_26 = arith.constant 0.00999999977 : f32
    %50 = vector.broadcast %cst_26 : f32 to vector<32x32xf32>
    %51 = arith.mulf %50, %47 : vector<32x32xf32>
    %52 = arith.select %49, %47, %51 : vector<32x32xi1>, vector<32x32xf32>
    %cst_27 = arith.constant dense<0.000000e+00> : vector<32x32xf32>
    %53 = tpu.matmul %0, %52, %cst_27 {dimension_numbers = #tpu.dot_dimension_numbers<[1], [0], [0], [1], [0, 0, 1, 1], [], []>} : vector<32x32xf32>, vector<32x32xf32>, vector<32x32xf32> -> vector<32x32xf32>
    %c192 = arith.constant 192 : index
    %c0_28 = arith.constant 0 : index
    %54 = vector.load %arg1[%c192, %c0_28] : memref<992x64xf32, #tpu.memory_space<vmem>>, vector<32x32xf32>
    %cst_29 = arith.constant dense<0.000000e+00> : vector<32x32xf32>
    %55 = tpu.matmul %53, %54, %cst_29 {dimension_numbers = #tpu.dot_dimension_numbers<[1], [0], [0], [1], [0, 0, 1, 1], [], []>} : vector<32x32xf32>, vector<32x32xf32>, vector<32x32xf32> -> vector<32x32xf32>
    %c224 = arith.constant 224 : index
    %c0_30 = arith.constant 0 : index
    %56 = vector.load %arg1[%c224, %c0_30] : memref<992x64xf32, #tpu.memory_space<vmem>>, vector<1x32xf32>
    %57 = vector.broadcast %56 : vector<1x32xf32> to vector<32x32xf32>
    %58 = arith.addf %55, %57 : vector<32x32xf32>
    %c232 = arith.constant 232 : index
    %c0_31 = arith.constant 0 : index
    %59 = vector.load %arg1[%c232, %c0_31] : memref<992x64xf32, #tpu.memory_space<vmem>>, vector<32x32xf32>
    %cst_32 = arith.constant dense<0.000000e+00> : vector<32x32xf32>
    %60 = tpu.matmul %52, %59, %cst_32 {dimension_numbers = #tpu.dot_dimension_numbers<[1], [0], [0], [1], [0, 0, 1, 1], [], []>} : vector<32x32xf32>, vector<32x32xf32>, vector<32x32xf32> -> vector<32x32xf32>
    %61 = arith.addf %58, %60 : vector<32x32xf32>
    %cst_33 = arith.constant 0.000000e+00 : f32
    %62 = vector.broadcast %cst_33 : f32 to vector<32x32xf32>
    %63 = arith.cmpf ogt, %61, %62 : vector<32x32xf32>
    %cst_34 = arith.constant 0.00999999977 : f32
    %64 = vector.broadcast %cst_34 : f32 to vector<32x32xf32>
    %65 = arith.mulf %64, %61 : vector<32x32xf32>
    %66 = arith.select %63, %61, %65 : vector<32x32xi1>, vector<32x32xf32>
    %c264 = arith.constant 264 : index
    %c0_35 = arith.constant 0 : index
    %67 = vector.load %arg1[%c264, %c0_35] : memref<992x64xf32, #tpu.memory_space<vmem>>, vector<32x32xf32>
    %cst_36 = arith.constant dense<0.000000e+00> : vector<32x32xf32>
    %68 = tpu.matmul %66, %67, %cst_36 {dimension_numbers = #tpu.dot_dimension_numbers<[1], [0], [0], [1], [0, 0, 1, 1], [], []>} : vector<32x32xf32>, vector<32x32xf32>, vector<32x32xf32> -> vector<32x32xf32>
    %c296 = arith.constant 296 : index
    %c0_37 = arith.constant 0 : index
    %69 = vector.load %arg1[%c296, %c0_37] : memref<992x64xf32, #tpu.memory_space<vmem>>, vector<1x32xf32>
    %70 = vector.broadcast %69 : vector<1x32xf32> to vector<32x32xf32>
    %71 = arith.addf %68, %70 : vector<32x32xf32>
    %cst_38 = arith.constant 0.000000e+00 : f32
    %72 = vector.broadcast %cst_38 : f32 to vector<32x32xf32>
    %73 = arith.cmpf ogt, %71, %72 : vector<32x32xf32>
    %cst_39 = arith.constant 0.00999999977 : f32
    %74 = vector.broadcast %cst_39 : f32 to vector<32x32xf32>
    %75 = arith.mulf %74, %71 : vector<32x32xf32>
    %76 = arith.select %73, %71, %75 : vector<32x32xi1>, vector<32x32xf32>
    %c304 = arith.constant 304 : index
    %c0_40 = arith.constant 0 : index
    %77 = vector.load %arg1[%c304, %c0_40] : memref<992x64xf32, #tpu.memory_space<vmem>>, vector<32x32xf32>
    %cst_41 = arith.constant dense<0.000000e+00> : vector<32x32xf32>
    %78 = tpu.matmul %76, %77, %cst_41 {dimension_numbers = #tpu.dot_dimension_numbers<[1], [0], [0], [1], [0, 0, 1, 1], [], []>} : vector<32x32xf32>, vector<32x32xf32>, vector<32x32xf32> -> vector<32x32xf32>
    %c336 = arith.constant 336 : index
    %c0_42 = arith.constant 0 : index
    %79 = vector.load %arg1[%c336, %c0_42] : memref<992x64xf32, #tpu.memory_space<vmem>>, vector<1x32xf32>
    %80 = vector.broadcast %79 : vector<1x32xf32> to vector<32x32xf32>
    %81 = arith.addf %78, %80 : vector<32x32xf32>
    %c920 = arith.constant 920 : index
    %c0_43 = arith.constant 0 : index
    %82 = vector.load %arg1[%c920, %c0_43] : memref<992x64xf32, #tpu.memory_space<vmem>>, vector<72x32xf32>
    %cst_44 = arith.constant dense<0.000000e+00> : vector<72x32xf32>
    %83 = tpu.matmul %82, %81, %cst_44 {dimension_numbers = #tpu.dot_dimension_numbers<[1], [0], [0], [1], [0, 0, 1, 1], [], []>} : vector<72x32xf32>, vector<32x32xf32>, vector<72x32xf32> -> vector<72x32xf32>
    %c440 = arith.constant 440 : index
    %c0_45 = arith.constant 0 : index
    %84 = vector.load %arg1[%c440, %c0_45] : memref<992x64xf32, #tpu.memory_space<vmem>>, vector<1x32xf32>
    %85 = vector.extract_strided_slice %83 {offsets = [0, 0], sizes = [8, 32], strides = [1, 1]} : vector<72x32xf32> to vector<8x32xf32>
    %c344 = arith.constant 344 : index
    %c0_46 = arith.constant 0 : index
    %86 = vector.load %arg1[%c344, %c0_46] : memref<992x64xf32, #tpu.memory_space<vmem>>, vector<32x32xf32>
    %cst_47 = arith.constant dense<0.000000e+00> : vector<8x32xf32>
    %87 = tpu.matmul %85, %86, %cst_47 {dimension_numbers = #tpu.dot_dimension_numbers<[1], [0], [0], [1], [0, 0, 1, 1], [], []>} : vector<8x32xf32>, vector<32x32xf32>, vector<8x32xf32> -> vector<8x32xf32>
    %88 = vector.broadcast %84 : vector<1x32xf32> to vector<8x32xf32>
    %89 = arith.addf %88, %87 : vector<8x32xf32>
    %90 = vector.extract_strided_slice %83 {offsets = [8, 0], sizes = [8, 32], strides = [1, 1]} : vector<72x32xf32> to vector<8x32xf32>
    %c376 = arith.constant 376 : index
    %c0_48 = arith.constant 0 : index
    %91 = vector.load %arg1[%c376, %c0_48] : memref<992x64xf32, #tpu.memory_space<vmem>>, vector<32x32xf32>
    %cst_49 = arith.constant dense<0.000000e+00> : vector<8x32xf32>
    %92 = tpu.matmul %90, %91, %cst_49 {dimension_numbers = #tpu.dot_dimension_numbers<[1], [0], [0], [1], [0, 0, 1, 1], [], []>} : vector<8x32xf32>, vector<32x32xf32>, vector<8x32xf32> -> vector<8x32xf32>
    %93 = arith.addf %89, %92 : vector<8x32xf32>
    %94 = vector.extract_strided_slice %83 {offsets = [16, 0], sizes = [8, 32], strides = [1, 1]} : vector<72x32xf32> to vector<8x32xf32>
    %c408 = arith.constant 408 : index
    %c0_50 = arith.constant 0 : index
    %95 = vector.load %arg1[%c408, %c0_50] : memref<992x64xf32, #tpu.memory_space<vmem>>, vector<32x32xf32>
    %cst_51 = arith.constant dense<0.000000e+00> : vector<8x32xf32>
    %96 = tpu.matmul %94, %95, %cst_51 {dimension_numbers = #tpu.dot_dimension_numbers<[1], [0], [0], [1], [0, 0, 1, 1], [], []>} : vector<8x32xf32>, vector<32x32xf32>, vector<8x32xf32> -> vector<8x32xf32>
    %97 = arith.addf %93, %96 : vector<8x32xf32>
    %cst_52 = arith.constant 0.000000e+00 : f32
    %98 = vector.broadcast %cst_52 : f32 to vector<8x32xf32>
    %99 = arith.cmpf ogt, %97, %98 : vector<8x32xf32>
    %cst_53 = arith.constant 0.00999999977 : f32
    %100 = vector.broadcast %cst_53 : f32 to vector<8x32xf32>
    %101 = arith.mulf %100, %97 : vector<8x32xf32>
    %102 = arith.select %99, %97, %101 : vector<8x32xi1>, vector<8x32xf32>
    %c448 = arith.constant 448 : index
    %c0_54 = arith.constant 0 : index
    %103 = vector.load %arg1[%c448, %c0_54] : memref<992x64xf32, #tpu.memory_space<vmem>>, vector<32x16xf32>
    %cst_55 = arith.constant dense<0.000000e+00> : vector<8x16xf32>
    %104 = tpu.matmul %102, %103, %cst_55 {dimension_numbers = #tpu.dot_dimension_numbers<[1], [0], [0], [1], [0, 0, 1, 1], [], []>} : vector<8x32xf32>, vector<32x16xf32>, vector<8x16xf32> -> vector<8x16xf32>
    %c480 = arith.constant 480 : index
    %c0_56 = arith.constant 0 : index
    %105 = vector.load %arg1[%c480, %c0_56] : memref<992x64xf32, #tpu.memory_space<vmem>>, vector<1x16xf32>
    %106 = vector.broadcast %105 : vector<1x16xf32> to vector<8x16xf32>
    %107 = arith.addf %104, %106 : vector<8x16xf32>
    %cst_57 = arith.constant 0.000000e+00 : f32
    %108 = vector.broadcast %cst_57 : f32 to vector<8x16xf32>
    %109 = arith.cmpf ogt, %107, %108 : vector<8x16xf32>
    %cst_58 = arith.constant 0.00999999977 : f32
    %110 = vector.broadcast %cst_58 : f32 to vector<8x16xf32>
    %111 = arith.mulf %110, %107 : vector<8x16xf32>
    %112 = arith.select %109, %107, %111 : vector<8x16xi1>, vector<8x16xf32>
    %c488 = arith.constant 488 : index
    %c0_59 = arith.constant 0 : index
    %113 = vector.load %arg1[%c488, %c0_59] : memref<992x64xf32, #tpu.memory_space<vmem>>, vector<16x1xf32>
    %cst_60 = arith.constant dense<0.000000e+00> : vector<8x1xf32>
    %114 = tpu.matmul %112, %113, %cst_60 {dimension_numbers = #tpu.dot_dimension_numbers<[1], [0], [0], [1], [0, 0, 1, 1], [], []>} : vector<8x16xf32>, vector<16x1xf32>, vector<8x1xf32> -> vector<8x1xf32>
    %c504 = arith.constant 504 : index
    %c0_61 = arith.constant 0 : index
    %115 = vector.load %arg1[%c504, %c0_61] : memref<992x64xf32, #tpu.memory_space<vmem>>, vector<1x1xf32>
    %116 = vector.broadcast %115 : vector<1x1xf32> to vector<8x1xf32>
    %117 = arith.addf %114, %116 : vector<8x1xf32>
    %c640 = arith.constant 640 : index
    %c0_62 = arith.constant 0 : index
    %118 = vector.load %arg1[%c640, %c0_62] : memref<992x64xf32, #tpu.memory_space<vmem>>, vector<1x64xf32>
    %119 = vector.extract_strided_slice %83 {offsets = [24, 0], sizes = [8, 32], strides = [1, 1]} : vector<72x32xf32> to vector<8x32xf32>
    %c512 = arith.constant 512 : index
    %c0_63 = arith.constant 0 : index
    %120 = vector.load %arg1[%c512, %c0_63] : memref<992x64xf32, #tpu.memory_space<vmem>>, vector<32x64xf32>
    %cst_64 = arith.constant dense<0.000000e+00> : vector<8x64xf32>
    %121 = tpu.matmul %119, %120, %cst_64 {dimension_numbers = #tpu.dot_dimension_numbers<[1], [0], [0], [1], [0, 0, 1, 1], [], []>} : vector<8x32xf32>, vector<32x64xf32>, vector<8x64xf32> -> vector<8x64xf32>
    %122 = vector.broadcast %118 : vector<1x64xf32> to vector<8x64xf32>
    %123 = arith.addf %122, %121 : vector<8x64xf32>
    %124 = vector.extract_strided_slice %83 {offsets = [32, 0], sizes = [8, 32], strides = [1, 1]} : vector<72x32xf32> to vector<8x32xf32>
    %c544 = arith.constant 544 : index
    %c0_65 = arith.constant 0 : index
    %125 = vector.load %arg1[%c544, %c0_65] : memref<992x64xf32, #tpu.memory_space<vmem>>, vector<32x64xf32>
    %cst_66 = arith.constant dense<0.000000e+00> : vector<8x64xf32>
    %126 = tpu.matmul %124, %125, %cst_66 {dimension_numbers = #tpu.dot_dimension_numbers<[1], [0], [0], [1], [0, 0, 1, 1], [], []>} : vector<8x32xf32>, vector<32x64xf32>, vector<8x64xf32> -> vector<8x64xf32>
    %127 = arith.addf %123, %126 : vector<8x64xf32>
    %128 = vector.extract_strided_slice %83 {offsets = [40, 0], sizes = [8, 32], strides = [1, 1]} : vector<72x32xf32> to vector<8x32xf32>
    %c576 = arith.constant 576 : index
    %c0_67 = arith.constant 0 : index
    %129 = vector.load %arg1[%c576, %c0_67] : memref<992x64xf32, #tpu.memory_space<vmem>>, vector<32x64xf32>
    %cst_68 = arith.constant dense<0.000000e+00> : vector<8x64xf32>
    %130 = tpu.matmul %128, %129, %cst_68 {dimension_numbers = #tpu.dot_dimension_numbers<[1], [0], [0], [1], [0, 0, 1, 1], [], []>} : vector<8x32xf32>, vector<32x64xf32>, vector<8x64xf32> -> vector<8x64xf32>
    %131 = arith.addf %127, %130 : vector<8x64xf32>
    %132 = vector.extract_strided_slice %83 {offsets = [48, 0], sizes = [8, 32], strides = [1, 1]} : vector<72x32xf32> to vector<8x32xf32>
    %c608 = arith.constant 608 : index
    %c0_69 = arith.constant 0 : index
    %133 = vector.load %arg1[%c608, %c0_69] : memref<992x64xf32, #tpu.memory_space<vmem>>, vector<32x64xf32>
    %cst_70 = arith.constant dense<0.000000e+00> : vector<8x64xf32>
    %134 = tpu.matmul %132, %133, %cst_70 {dimension_numbers = #tpu.dot_dimension_numbers<[1], [0], [0], [1], [0, 0, 1, 1], [], []>} : vector<8x32xf32>, vector<32x64xf32>, vector<8x64xf32> -> vector<8x64xf32>
    %135 = arith.addf %131, %134 : vector<8x64xf32>
    %cst_71 = arith.constant 0.000000e+00 : f32
    %136 = vector.broadcast %cst_71 : f32 to vector<8x64xf32>
    %137 = arith.cmpf ogt, %135, %136 : vector<8x64xf32>
    %cst_72 = arith.constant 0.00999999977 : f32
    %138 = vector.broadcast %cst_72 : f32 to vector<8x64xf32>
    %139 = arith.mulf %138, %135 : vector<8x64xf32>
    %140 = arith.select %137, %135, %139 : vector<8x64xi1>, vector<8x64xf32>
    %c648 = arith.constant 648 : index
    %c0_73 = arith.constant 0 : index
    %141 = vector.load %arg1[%c648, %c0_73] : memref<992x64xf32, #tpu.memory_space<vmem>>, vector<64x32xf32>
    %cst_74 = arith.constant dense<0.000000e+00> : vector<8x32xf32>
    %142 = tpu.matmul %140, %141, %cst_74 {dimension_numbers = #tpu.dot_dimension_numbers<[1], [0], [0], [1], [0, 0, 1, 1], [], []>} : vector<8x64xf32>, vector<64x32xf32>, vector<8x32xf32> -> vector<8x32xf32>
    %c712 = arith.constant 712 : index
    %c0_75 = arith.constant 0 : index
    %143 = vector.load %arg1[%c712, %c0_75] : memref<992x64xf32, #tpu.memory_space<vmem>>, vector<1x32xf32>
    %144 = vector.broadcast %143 : vector<1x32xf32> to vector<8x32xf32>
    %145 = arith.addf %142, %144 : vector<8x32xf32>
    %cst_76 = arith.constant 0.000000e+00 : f32
    %146 = vector.broadcast %cst_76 : f32 to vector<8x32xf32>
    %147 = arith.cmpf ogt, %145, %146 : vector<8x32xf32>
    %cst_77 = arith.constant 0.00999999977 : f32
    %148 = vector.broadcast %cst_77 : f32 to vector<8x32xf32>
    %149 = arith.mulf %148, %145 : vector<8x32xf32>
    %150 = arith.select %147, %145, %149 : vector<8x32xi1>, vector<8x32xf32>
    %c720 = arith.constant 720 : index
    %c0_78 = arith.constant 0 : index
    %151 = vector.load %arg1[%c720, %c0_78] : memref<992x64xf32, #tpu.memory_space<vmem>>, vector<32x16xf32>
    %cst_79 = arith.constant dense<0.000000e+00> : vector<8x16xf32>
    %152 = tpu.matmul %150, %151, %cst_79 {dimension_numbers = #tpu.dot_dimension_numbers<[1], [0], [0], [1], [0, 0, 1, 1], [], []>} : vector<8x32xf32>, vector<32x16xf32>, vector<8x16xf32> -> vector<8x16xf32>
    %c752 = arith.constant 752 : index
    %c0_80 = arith.constant 0 : index
    %153 = vector.load %arg1[%c752, %c0_80] : memref<992x64xf32, #tpu.memory_space<vmem>>, vector<1x16xf32>
    %154 = vector.broadcast %153 : vector<1x16xf32> to vector<8x16xf32>
    %155 = arith.addf %152, %154 : vector<8x16xf32>
    %cst_81 = arith.constant 0.000000e+00 : f32
    %156 = vector.broadcast %cst_81 : f32 to vector<8x16xf32>
    %157 = arith.cmpf ogt, %155, %156 : vector<8x16xf32>
    %cst_82 = arith.constant 0.00999999977 : f32
    %158 = vector.broadcast %cst_82 : f32 to vector<8x16xf32>
    %159 = arith.mulf %158, %155 : vector<8x16xf32>
    %160 = arith.select %157, %155, %159 : vector<8x16xi1>, vector<8x16xf32>
    %c760 = arith.constant 760 : index
    %c0_83 = arith.constant 0 : index
    %161 = vector.load %arg1[%c760, %c0_83] : memref<992x64xf32, #tpu.memory_space<vmem>>, vector<16x1xf32>
    %cst_84 = arith.constant dense<0.000000e+00> : vector<8x1xf32>
    %162 = tpu.matmul %160, %161, %cst_84 {dimension_numbers = #tpu.dot_dimension_numbers<[1], [0], [0], [1], [0, 0, 1, 1], [], []>} : vector<8x16xf32>, vector<16x1xf32>, vector<8x1xf32> -> vector<8x1xf32>
    %c776 = arith.constant 776 : index
    %c0_85 = arith.constant 0 : index
    %163 = vector.load %arg1[%c776, %c0_85] : memref<992x64xf32, #tpu.memory_space<vmem>>, vector<1x1xf32>
    %164 = vector.broadcast %163 : vector<1x1xf32> to vector<8x1xf32>
    %165 = arith.addf %162, %164 : vector<8x1xf32>
    %c848 = arith.constant 848 : index
    %c0_86 = arith.constant 0 : index
    %166 = vector.load %arg1[%c848, %c0_86] : memref<992x64xf32, #tpu.memory_space<vmem>>, vector<1x32xf32>
    %167 = vector.extract_strided_slice %83 {offsets = [56, 0], sizes = [8, 32], strides = [1, 1]} : vector<72x32xf32> to vector<8x32xf32>
    %c784 = arith.constant 784 : index
    %c0_87 = arith.constant 0 : index
    %168 = vector.load %arg1[%c784, %c0_87] : memref<992x64xf32, #tpu.memory_space<vmem>>, vector<32x32xf32>
    %cst_88 = arith.constant dense<0.000000e+00> : vector<8x32xf32>
    %169 = tpu.matmul %167, %168, %cst_88 {dimension_numbers = #tpu.dot_dimension_numbers<[1], [0], [0], [1], [0, 0, 1, 1], [], []>} : vector<8x32xf32>, vector<32x32xf32>, vector<8x32xf32> -> vector<8x32xf32>
    %170 = vector.broadcast %166 : vector<1x32xf32> to vector<8x32xf32>
    %171 = arith.addf %170, %169 : vector<8x32xf32>
    %172 = vector.extract_strided_slice %83 {offsets = [64, 0], sizes = [8, 32], strides = [1, 1]} : vector<72x32xf32> to vector<8x32xf32>
    %c816 = arith.constant 816 : index
    %c0_89 = arith.constant 0 : index
    %173 = vector.load %arg1[%c816, %c0_89] : memref<992x64xf32, #tpu.memory_space<vmem>>, vector<32x32xf32>
    %cst_90 = arith.constant dense<0.000000e+00> : vector<8x32xf32>
    %174 = tpu.matmul %172, %173, %cst_90 {dimension_numbers = #tpu.dot_dimension_numbers<[1], [0], [0], [1], [0, 0, 1, 1], [], []>} : vector<8x32xf32>, vector<32x32xf32>, vector<8x32xf32> -> vector<8x32xf32>
    %175 = arith.addf %171, %174 : vector<8x32xf32>
    %cst_91 = arith.constant 0.000000e+00 : f32
    %176 = vector.broadcast %cst_91 : f32 to vector<8x32xf32>
    %177 = arith.cmpf ogt, %175, %176 : vector<8x32xf32>
    %cst_92 = arith.constant 0.00999999977 : f32
    %178 = vector.broadcast %cst_92 : f32 to vector<8x32xf32>
    %179 = arith.mulf %178, %175 : vector<8x32xf32>
    %180 = arith.select %177, %175, %179 : vector<8x32xi1>, vector<8x32xf32>
    %c856 = arith.constant 856 : index
    %c0_93 = arith.constant 0 : index
    %181 = vector.load %arg1[%c856, %c0_93] : memref<992x64xf32, #tpu.memory_space<vmem>>, vector<32x16xf32>
    %cst_94 = arith.constant dense<0.000000e+00> : vector<8x16xf32>
    %182 = tpu.matmul %180, %181, %cst_94 {dimension_numbers = #tpu.dot_dimension_numbers<[1], [0], [0], [1], [0, 0, 1, 1], [], []>} : vector<8x32xf32>, vector<32x16xf32>, vector<8x16xf32> -> vector<8x16xf32>
    %c888 = arith.constant 888 : index
    %c0_95 = arith.constant 0 : index
    %183 = vector.load %arg1[%c888, %c0_95] : memref<992x64xf32, #tpu.memory_space<vmem>>, vector<1x16xf32>
    %184 = vector.broadcast %183 : vector<1x16xf32> to vector<8x16xf32>
    %185 = arith.addf %182, %184 : vector<8x16xf32>
    %cst_96 = arith.constant 0.000000e+00 : f32
    %186 = vector.broadcast %cst_96 : f32 to vector<8x16xf32>
    %187 = arith.cmpf ogt, %185, %186 : vector<8x16xf32>
    %cst_97 = arith.constant 0.00999999977 : f32
    %188 = vector.broadcast %cst_97 : f32 to vector<8x16xf32>
    %189 = arith.mulf %188, %185 : vector<8x16xf32>
    %190 = arith.select %187, %185, %189 : vector<8x16xi1>, vector<8x16xf32>
    %c896 = arith.constant 896 : index
    %c0_98 = arith.constant 0 : index
    %191 = vector.load %arg1[%c896, %c0_98] : memref<992x64xf32, #tpu.memory_space<vmem>>, vector<16x1xf32>
    %cst_99 = arith.constant dense<0.000000e+00> : vector<8x1xf32>
    %192 = tpu.matmul %190, %191, %cst_99 {dimension_numbers = #tpu.dot_dimension_numbers<[1], [0], [0], [1], [0, 0, 1, 1], [], []>} : vector<8x16xf32>, vector<16x1xf32>, vector<8x1xf32> -> vector<8x1xf32>
    %c912 = arith.constant 912 : index
    %c0_100 = arith.constant 0 : index
    %193 = vector.load %arg1[%c912, %c0_100] : memref<992x64xf32, #tpu.memory_space<vmem>>, vector<1x1xf32>
    %194 = vector.broadcast %193 : vector<1x1xf32> to vector<8x1xf32>
    %195 = arith.addf %192, %194 : vector<8x1xf32>
    %196 = tpu.concatenate %117, %165, %195 in 1 : vector<8x1xf32>, vector<8x1xf32>, vector<8x1xf32> -> vector<8x3xf32>
    %197 = vector.extract_strided_slice %196 {offsets = [0, 0], sizes = [2, 3], strides = [1, 1]} : vector<8x3xf32> to vector<2x3xf32>
    %c0_101 = arith.constant 0 : index
    %c0_102 = arith.constant 0 : index
    %198 = vector.load %arg2[%c0_101, %c0_102] : memref<2x3xf32, #tpu.memory_space<vmem>>, vector<2x3xf32>
    tpu.vector_store %arg2[%c0_101, %c0_102], %197 {strides = array<i32>} : memref<2x3xf32, #tpu.memory_space<vmem>>, vector<2x3xf32>,
    return
  }
}

</mosaic_0001>

<bundles_post_ra>
// kernel: tpu_custom_call.1
= control target key start
LH: loop header
LB: loop body
LE: loop exit
PB: predicated region body
PF: predicated region fallthrough
CT: control target
= control target key end

     0   :  { %v3751_v2 = vmov 32   ;;  %s4360_s0 = inlined_call_operand.vmem [shape: f32[32,33], index: 0, kind: input, shape index: {}]   ;;  %s4361_s1 = inlined_call_operand.vmem [shape: f32[992,64], index: 1, kind: input, shape index: {}]   ;;  %s4362_s2 = inlined_call_operand.hbm [shape: f32[2,3], index: 2, kind: output, shape index: {}]  }
   0x1   :  { %v3776_v0 = vld [vmem:[%s4360_s0 + $0x10] sm:$0xff]  ;;  %v3781_v1 = vld [vmem:[%s4360_s0] sm:$0xff]  ;;  %3726 = vset.pattern.permute.xlu1 %v3751_v2  ;;  %3725 = vset.pattern.permute.xlu0 %v3751_v2  ;;  %v66_v3 = vld [vmem:[%s4361_s1 + $0x8] sm:$0xff] }
   0x2   :  { %29 = vperm.xlu1 %3726, %v3776_v0   ;;  %19 = vperm.xlu0 %3725, %v3781_v1   ;;  %v67_v4 = vld [vmem:[%s4361_s1 + $0x10] sm:$0xff] }
   0x3   :  { %7 = vsyncpa [#allocation3], 0  ;;  %v3794_v5 = vld [vmem:[%s4360_s0 + $0x18] sm:$0xff]  ;;  %v3799_v6 = vld [vmem:[%s4360_s0 + $0x8] sm:$0xff]  ;;  %v3484_v7 = vpack.c.bf16 %v67_v4, %v66_v3  ;;  %vm75_vm0 = vcmask 261120   ;;  %s3755_s23 = smov 1  }
   0x4   :  { %v68_v8 = vld [vmem:[%s4361_s1 + $0x18] sm:$0xff]  ;;  %v69_v9 = vld [vmem:[%s4361_s1 + $0x20] sm:$0xff]  ;;  %3131 = vmatprep.mubr.msk.f32.mxu1 %vm75_vm0, %v3781_v1  ;;  %v278_v33 = vld [vmem:[%s4361_s1 + $0x30] sm:$0xff]  ;;  %s3756_s5 = smov 2   ;;  %s3757_s8 = smov [#allocation2]  }
   0x5   :  { %3485 = vmatprep.subr.bf16.mxu0 %v3484_v7  ;;  %v3488_v10 = vpack.c.bf16 %v69_v9, %v68_v8  ;;  %v2831_v11 = vld [vmem:[%s4361_s1] ss:$0 sm:$0xff]  ;;  %v2832_v12 = vld [vmem:[%s4361_s1 + $0x1] ss:$0 sm:$0xff]  ;;  %v279_v34 = vld [vmem:[%s4361_s1 + $0x38] sm:$0xff]  ;;  %s2823_s9 = sshll.u32 %s3757_s8, 4  ;;  %s2824_s9 = int_to_ptr.vmem [resolvable:$true] %s2823_s9 }
   0x6   :  { %34 = vperm.xlu1 %3726, %v3794_v5   ;;  %24 = vperm.xlu0 %3725, %v3799_v6   ;;  %v280_v35 = vld [vmem:[%s4361_s1 + $0x40] sm:$0xff]  ;;  %v3500_v36 = vpack.c.bf16 %v279_v34, %v278_v33  ;;  %v281_v37 = vld [vmem:[%s4361_s1 + $0x48] sm:$0xff]  ;;  %v384_v58 = vld [vmem:[%s4361_s1 + $0x58] sm:$0xff]  ;;  %s3727_s10 = scalar_lea.vmem %s2824_s9, 32  ;;  %p3732_p1 = scmp.lt.s32.totalorder %s2824_s9, %s2824_s9 }
   0x7   :  { %3487 = vmatpush3.bf16.msra.mxu0 %v3484_v7  ;;  %v3504_v38 = vpack.c.bf16 %v281_v37, %v280_v35  ;;  %v2833_v39 = vld [vmem:[%s4361_s1 + $0x28] ss:$0 sm:$0xff]  ;;  %v385_v59 = vld [vmem:[%s4361_s1 + $0x60] sm:$0xff]  ;;  %v387_v62 = vld [vmem:[%s4361_s1 + $0x70] sm:$0xff]  ;;  %p3728_p0 = scmp.ne.s32.totalorder %s2824_s9, %s3727_s10  ;;  %p3733_p2 = scmp.lt.s32.totalorder %s3727_s10, %s3727_s10 }
   0x8   :  { %3489 = vmatprep.subr.bf16.mxu0 %v3488_v10  ;;  %v3508_v60 = vpack.c.bf16 %v385_v59, %v384_v58  ;;  %v386_v61 = vld [vmem:[%s4361_s1 + $0x68] sm:$0xff]  ;;  %v2842_v8 = vld [vmem:[%s4361_s1 + $0x50] ss:$0 sm:$0xff] }
   0x9   :  { %v3512_v3 = vpack.c.bf16 %v387_v62, %v386_v61  ;;  %v592_v33 = vld [vmem:[%s4361_s1 + $0x88] sm:$0xff]  ;;  %v593_v34 = vld [vmem:[%s4361_s1 + $0x90] sm:$0xff]  ;;  %v898_v62 = vld [vmem:[%s4361_s1 + $0xc0] sm:$0xff]  ;;  %p3734_p3 = por %p3733_p2, %p3732_p1 }
   0xa   :  { %v3528_v35 = vpack.c.bf16 %v593_v34, %v592_v33  ;;  %v697_v37 = vld [vmem:[%s4361_s1 + $0xa8] sm:$0xff] }
   0xb   :  { %3491 = vmatpush3.bf16.msra.mxu0 %v3488_v10  ;;  %p3735_p4 = pnand %p3734_p3, %p3728_p0 }
   0xc   :  { %3501 = vmatprep.subr.bf16.mxu0 %v3500_v36 }
  0x81   :  { %v30_v13 = vpop.permute.xlu1 %29  ;;  %v20_v14 = vpop.permute.xlu0 %19 }
  0x82   :  { %v43_v15 = vmul.f32 %v2831_v11, %v30_v13  ;;  %v41_v16 = vmul.f32 %v2831_v11, %v20_v14 }
  0x84   :  { %v50_v17 = vadd.f32 %v2832_v12, %v41_v16  ;;  %v52_v18 = vadd.f32 %v2832_v12, %v43_v15 }
  0x85   :  { %v35_v19 = vpop.permute.xlu1 %34  ;;  %v25_v20 = vpop.permute.xlu0 %24 }
  0x86   :  { %v44_v21 = vmul.f32 %v2831_v11, %v35_v19  ;;  %v42_v22 = vmul.f32 %v2831_v11, %v25_v20  ;;  %vm54_vm1 = vcmp.gt.f32.partialorder %v50_v17, 0.0  ;;  %v58_v23 = vmul.f32 0.01, %v50_v17 }
  0x87   :  { %v60_v26 = vmul.f32 0.01, %v52_v18  ;;  %vm56_vm3 = vcmp.gt.f32.partialorder %v52_v18, 0.0 }
  0x88   :  { %v53_v24 = vadd.f32 %v2832_v12, %v44_v21  ;;  %v51_v25 = vadd.f32 %v2832_v12, %v42_v22  ;;  %v62_v27 = vsel %vm54_vm1, %v50_v17, %v58_v23 }
  0x89   :  { %3117 = vmatprep.mubr.msk.f32.mxu0 %vm75_vm0, %v62_v27  ;;  %v64_v31 = vsel %vm56_vm3, %v52_v18, %v60_v26 }
  0x8a   :  { %v59_v28 = vmul.f32 0.01, %v51_v25  ;;  %vm55_vm2 = vcmp.gt.f32.partialorder %v51_v25, 0.0  ;;  %v61_v29 = vmul.f32 0.01, %v53_v24  ;;  %vm57_vm4 = vcmp.gt.f32.partialorder %v53_v24, 0.0 }
  0x8c   :  { %v63_v30 = vsel %vm55_vm2, %v51_v25, %v59_v28  ;;  %v65_v32 = vsel %vm57_vm4, %v53_v24, %v61_v29  ;;  %v590_v28 = vld [vmem:[%s4361_s1 + $0x78] sm:$0xff]  ;;  %v591_v29 = vld [vmem:[%s4361_s1 + $0x80] sm:$0xff] }
  0x8d   :  { %3118 = vmatmul.mubr.msk.f32.vlgmr.msra.gmra.mrb[0].mxu0 %vm75_vm0, %v63_v30 }
  0x8e   :  { %3120 = vmatprep.mubr.msk.f32.mxu0 %vm75_vm0, %v64_v31  ;;  %3503 = vmatpush3.bf16.msra.mxu0 %v3500_v36  ;;  %v696_v36 = vld [vmem:[%s4361_s1 + $0xa0] sm:$0xff] }
  0x8f   :  { %3505 = vmatprep.subr.bf16.mxu0 %v3504_v38 }
  0x91   :  { %3121 = vmatmul.mubr.msk.f32.gmra.mrb[2].mxu0 %vm75_vm0, %v65_v32  ;;  %v3524_v32 = vpack.c.bf16 %v591_v29, %v590_v28 }
  0x92   :  { %3507 = vmatpush3.bf16.msra.mxu0 %v3504_v38  ;;  %v3532_v38 = vpack.c.bf16 %v697_v37, %v696_v36 }
  0x93   :  { %3509 = vmatprep.subr.bf16.mxu0 %v3508_v60 }
 0x160   :  { %v3119_v40 = vpop.f32.mrb[0].mxu0 }
 0x161   :  { %v160_v41 = vadd.f32 %v3119_v40, %v2833_v39  ;;  %v154_v42 = vpop.f32.mrb[1].mxu0  ;;  %v699_v40 = vld [vmem:[%s4361_s1 + $0xb8] sm:$0xff] }
 0x162   :  { %v155_v43 = vadd.f32 %v2833_v39, %v154_v42 }
 0x163   :  { %vm174_vm5 = vcmp.gt.f32.partialorder %v160_v41, 0.0  ;;  %v178_v44 = vmul.f32 0.01, %v160_v41 }
 0x164   :  { %vm173_vm6 = vcmp.gt.f32.partialorder %v155_v43, 0.0  ;;  %v177_v45 = vmul.f32 0.01, %v155_v43  ;;  %v3122_v46 = vpop.f32.mrb[2].mxu0 }
 0x165   :  { %v170_v47 = vadd.f32 %v3122_v46, %v2833_v39  ;;  %v164_v48 = vpop.f32.mrb[3].mxu0  ;;  %v182_v49 = vsel %vm174_vm5, %v160_v41, %v178_v44  ;;  %v2855_v46 = vld [vmem:[%s4361_s1 + $0x98] ss:$0 sm:$0xff] }
 0x166   :  { %v165_v50 = vadd.f32 %v2833_v39, %v164_v48  ;;  %v181_v51 = vsel %vm173_vm6, %v155_v43, %v177_v45  ;;  %v698_v39 = vld [vmem:[%s4361_s1 + $0xb0] sm:$0xff] }
 0x167   :  { %vm176_vm7 = vcmp.gt.f32.partialorder %v170_v47, 0.0  ;;  %v180_v52 = vmul.f32 0.01, %v170_v47  ;;  %v3492_v53 = vpack.c.bf16 %v182_v49, %v181_v51  ;;  %v3536_v43 = vpack.c.bf16 %v699_v40, %v698_v39  ;;  %v1239_v40 = vld [vmem:[%s4361_s1 + $0x130] sm:$0xff] }
 0x168   :  { %vm175_vm8 = vcmp.gt.f32.partialorder %v165_v50, 0.0  ;;  %v179_v54 = vmul.f32 0.01, %v165_v50 }
 0x169   :  { %v184_v55 = vsel %vm176_vm7, %v170_v47, %v180_v52  ;;  %3493 = vmatprep.subr.bf16.mxu1 %v3492_v53 }
 0x16a   :  { %v183_v56 = vsel %vm175_vm8, %v165_v50, %v179_v54  ;;  %3495 = vmatpush3.bf16.msra.mxu1 %v3492_v53 }
 0x16b   :  { %v3496_v57 = vpack.c.bf16 %v184_v55, %v183_v56 }
 0x16d   :  { %3497 = vmatprep.subr.bf16.mxu1 %v3496_v57 }
 0x16e   :  { %3499 = vmatpush3.bf16.msra.mxu1 %v3496_v57 }
 0x171   :  { %3132 = vmatmul.mubr.msk.f32.vlgmr.msra.gmra.mrb[0].mxu1 %vm75_vm0, %v3799_v6 }
 0x172   :  { %3134 = vmatprep.mubr.msk.f32.mxu1 %vm75_vm0, %v3776_v0 }
 0x175   :  { %3135 = vmatmul.mubr.msk.f32.gmra.mrb[2].mxu1 %vm75_vm0, %v3794_v5 }
 0x176   :  { %3173 = vmatprep.mubr.msk.f32.mxu1 %vm75_vm0, %v3781_v1 }
 0x244   :  { %v3133_v63 = vpop.f32.mrb[0].mxu1 }
 0x245   :  { %v259_v2 = vpop.f32.mrb[1].mxu1 }
 0x246   :  { %3145 = vmatprep.mubr.msk.f32.mxu0 %vm75_vm0, %v259_v2 }
 0x247   :  { %3146 = vmatmul.mubr.msk.f32.vlgmr.msra.gmra.mrb[4].mxu0 %vm75_vm0, %v3133_v63  ;;  %v899_v63 = vld [vmem:[%s4361_s1 + $0xc8] sm:$0xff] }
 0x248   :  { %v3136_v4 = vpop.f32.mrb[2].mxu1  ;;  %3511 = vmatpush3.bf16.msra.mxu0 %v3508_v60 }
 0x249   :  { %v269_v7 = vpop.f32.mrb[3].mxu1  ;;  %3513 = vmatprep.subr.bf16.mxu0 %v3512_v3 }
 0x24a   :  { %3148 = vmatprep.mubr.msk.f32.mxu0 %vm75_vm0, %v269_v7  ;;  %v3548_v7 = vpack.c.bf16 %v899_v63, %v898_v62  ;;  %v3752_v63 = vmov 0.0|0.0  }
 0x24b   :  { %3149 = vmatmul.mubr.msk.f32.gmra.mrb[6].mxu0 %vm75_vm0, %v3136_v4 }
 0x24c   :  { %3515 = vmatpush3.bf16.msra.mxu0 %v3512_v3  ;;  %3159 = vmatprep.mubr.msk.f32.mxu0 %vm75_vm0, %v181_v51 }
 0x24f   :  { %3160 = vmatmul.mubr.msk.f32.vlgmr.msra.gmra.mrb[4].mxu0 %vm75_vm0, %v182_v49 }
 0x250   :  { %3162 = vmatprep.mubr.msk.f32.mxu0 %vm75_vm0, %v183_v56 }
 0x253   :  { %3163 = vmatmul.mubr.msk.f32.gmra.mrb[6].mxu0 %vm75_vm0, %v184_v55 }
 0x254   :  { %3215 = vmatprep.mubr.msk.f32.mxu0 %vm75_vm0, %v3781_v1 }
 0x322   :  { %v3161_v9 = vpop.f32.mrb[4].mxu0 }
 0x323   :  { %v3679_v10 = vadd.f32 %v3161_v9, %v2842_v8  ;;  %v466_v11 = vpop.f32.mrb[5].mxu0  ;;  %v901_v9 = vld [vmem:[%s4361_s1 + $0xd8] sm:$0xff] }
 0x324   :  { %v3680_v12 = vadd.f32 %v2842_v8, %v466_v11  ;;  %v1004_v11 = vld [vmem:[%s4361_s1 + $0xe8] sm:$0xff] }
 0x325   :  { %vm490_vm9 = vcmp.gt.f32.partialorder %v3679_v10, 0.0  ;;  %v494_v13 = vmul.f32 0.01, %v3679_v10 }
 0x326   :  { %vm489_vm10 = vcmp.gt.f32.partialorder %v3680_v12, 0.0  ;;  %v493_v14 = vmul.f32 0.01, %v3680_v12  ;;  %v3164_v15 = vpop.f32.mrb[6].mxu0 }
 0x327   :  { %v498_v16 = vsel %vm490_vm9, %v3679_v10, %v494_v13  ;;  %v3681_v17 = vadd.f32 %v3164_v15, %v2842_v8  ;;  %v476_v18 = vpop.f32.mrb[7].mxu0 }
 0x328   :  { %v497_v19 = vsel %vm489_vm10, %v3680_v12, %v493_v14  ;;  %v3682_v20 = vadd.f32 %v2842_v8, %v476_v18  ;;  %v502_v21 = vadd.f32 %v498_v16, %v182_v49  ;;  %v900_v8 = vld [vmem:[%s4361_s1 + $0xd0] sm:$0xff]  ;;  %v1121_v18 = vld [vmem:[%s4361_s1 + $0x108] sm:$0xff]  ;;  %vm3753_vm10 = vmmov 0  }
 0x329   :  { %vm492_vm11 = vcmp.gt.f32.partialorder %v3681_v17, 0.0  ;;  %v496_v1 = vmul.f32 0.01, %v3681_v17  ;;  %v501_v22 = vadd.f32 %v497_v19, %v181_v51  ;;  %v3552_v10 = vpack.c.bf16 %v901_v9, %v900_v8  ;;  %v1005_v12 = vld [vmem:[%s4361_s1 + $0xf0] sm:$0xff]  ;;  %v1494_v8 = vld [vmem:[%s4361_s1 + $0x168] sm:$0xff] }
 0x32a   :  { %vm491_vm12 = vcmp.gt.f32.partialorder %v3682_v20, 0.0  ;;  %v495_v23 = vmul.f32 0.01, %v3682_v20  ;;  %v3556_v13 = vpack.c.bf16 %v1005_v12, %v1004_v11  ;;  %v1122_v19 = vld [vmem:[%s4361_s1 + $0x110] sm:$0xff] }
 0x32b   :  { %v500_v24 = vsel %vm492_vm11, %v3681_v17, %v496_v1  ;;  %v3516_v25 = vpack.c.bf16 %v502_v21, %v501_v22  ;;  %v1124_v1 = vld [vmem:[%s4361_s1 + $0x120] sm:$0xff]  ;;  %v1495_v9 = vld [vmem:[%s4361_s1 + $0x170] sm:$0xff] }
 0x32c   :  { %v499_v26 = vsel %vm491_vm12, %v3682_v20, %v495_v23  ;;  %v504_v27 = vadd.f32 %v500_v24, %v184_v55  ;;  %v3564_v20 = vpack.c.bf16 %v1122_v19, %v1121_v18  ;;  %v2868_v23 = vld [vmem:[%s4361_s1 + $0xe0] ss:$0 sm:$0xff]  ;;  %v2882_v11 = vld [vmem:[%s4361_s1 + $0x150] ss:$0 sm:$0xff]  ;;  %v1345_v19 = vld [vmem:[%s4361_s1 + $0x398] sm:$0xff] }
 0x32d   :  { %3517 = vmatprep.subr.bf16.mxu1 %v3516_v25  ;;  %v503_v30 = vadd.f32 %v499_v26, %v183_v56 }
 0x32e   :  { %3519 = vmatpush3.bf16.msra.mxu1 %v3516_v25 }
 0x32f   :  { %v3520_v31 = vpack.c.bf16 %v504_v27, %v503_v30 }
 0x331   :  { %3521 = vmatprep.subr.bf16.mxu1 %v3520_v31 }
 0x332   :  { %3523 = vmatpush3.bf16.msra.mxu1 %v3520_v31 }
 0x333   :  { %3525 = vmatprep.subr.bf16.mxu1 %v3524_v32 }
 0x335   :  { %3174 = vmatmul.mubr.msk.f32.vlgmr.msra.gmra.mrb[4].mxu1 %vm75_vm0, %v3799_v6 }
 0x336   :  { %3176 = vmatprep.mubr.msk.f32.mxu1 %vm75_vm0, %v3776_v0  ;;  %3527 = vmatpush3.bf16.msra.mxu1 %v3524_v32 }
 0x337   :  { %3529 = vmatprep.subr.bf16.mxu1 %v3528_v35 }
 0x339   :  { %3177 = vmatmul.mubr.msk.f32.gmra.mrb[6].mxu1 %vm75_vm0, %v3794_v5 }
 0x33a   :  { %3531 = vmatpush3.bf16.msra.mxu1 %v3528_v35 }
 0x33b   :  { %3533 = vmatprep.subr.bf16.mxu1 %v3532_v38 }
 0x408   :  { %v3175_v41 = vpop.f32.mrb[4].mxu1 }
 0x409   :  { %v571_v42 = vpop.f32.mrb[5].mxu1 }
 0x40a   :  { %3187 = vmatprep.mubr.msk.f32.mxu1 %vm75_vm0, %v571_v42 }
 0x40b   :  { %3188 = vmatmul.mubr.msk.f32.vlgmr.msra.gmra.mrb[8].mxu1 %vm75_vm0, %v3175_v41  ;;  %v1240_v41 = vld [vmem:[%s4361_s1 + $0x138] sm:$0xff] }
 0x40c   :  { %v3178_v44 = vpop.f32.mrb[6].mxu1  ;;  %3535 = vmatpush3.bf16.msra.mxu1 %v3532_v38  ;;  %v3572_v42 = vpack.c.bf16 %v1240_v41, %v1239_v40  ;;  %v1652_v41 = vld [vmem:[%s4361_s1 + $0x198] sm:$0xff] }
 0x40d   :  { %v581_v45 = vpop.f32.mrb[7].mxu1  ;;  %3537 = vmatprep.subr.bf16.mxu1 %v3536_v43 }
 0x40e   :  { %3190 = vmatprep.mubr.msk.f32.mxu1 %vm75_vm0, %v581_v45 }
 0x40f   :  { %3191 = vmatmul.mubr.msk.f32.gmra.mrb[10].mxu1 %vm75_vm0, %v3178_v44  ;;  %v1242_v44 = vld [vmem:[%s4361_s1 + $0x148] sm:$0xff] }
 0x410   :  { %3539 = vmatpush3.bf16.msra.mxu1 %v3536_v43  ;;  %3201 = vmatprep.mubr.msk.f32.mxu1 %vm75_vm0, %v501_v22  ;;  %v1241_v43 = vld [vmem:[%s4361_s1 + $0x140] sm:$0xff] }
 0x411   :  { %3565 = vmatprep.subr.bf16.mxu1 %v3564_v20  ;;  %v3576_v45 = vpack.c.bf16 %v1242_v44, %v1241_v43 }
 0x413   :  { %3202 = vmatmul.mubr.msk.f32.vlgmr.msra.gmra.mrb[8].mxu1 %vm75_vm0, %v502_v21  ;;  %v1123_v21 = vld [vmem:[%s4361_s1 + $0x118] sm:$0xff] }
 0x414   :  { %3204 = vmatprep.mubr.msk.f32.mxu1 %vm75_vm0, %v503_v30  ;;  %3567 = vmatpush3.bf16.msra.mxu1 %v3564_v20  ;;  %v3568_v22 = vpack.c.bf16 %v1124_v1, %v1123_v21  ;;  %v1346_v20 = vld [vmem:[%s4361_s1 + $0x3a0] sm:$0xff]  ;;  %v1347_v21 = vld [vmem:[%s4361_s1 + $0x3a8] sm:$0xff]  ;;  %v1348_v1 = vld [vmem:[%s4361_s1 + $0x3b0] sm:$0xff] }
 0x416   :  { %3569 = vmatprep.subr.bf16.mxu1 %v3568_v22 }
 0x417   :  { %3205 = vmatmul.mubr.msk.f32.gmra.mrb[10].mxu1 %vm75_vm0, %v504_v27 }
 0x418   :  { %3571 = vmatpush3.bf16.msra.mxu1 %v3568_v22  ;;  %v1349_v22 = vld [vmem:[%s4361_s1 + $0x3b8] sm:$0xff] }
 0x419   :  { %3573 = vmatprep.subr.bf16.mxu1 %v3572_v42 }
 0x4e6   :  { %v3203_v47 = vpop.f32.mrb[8].mxu1 }
 0x4e7   :  { %v3683_v48 = vadd.f32 %v3203_v47, %v2855_v46  ;;  %v778_v49 = vpop.f32.mrb[9].mxu1 }
 0x4e8   :  { %v3684_v50 = vadd.f32 %v2855_v46, %v778_v49 }
 0x4e9   :  { %vm802_vm13 = vcmp.gt.f32.partialorder %v3683_v48, 0.0  ;;  %v806_v51 = vmul.f32 0.01, %v3683_v48 }
 0x4ea   :  { %vm801_vm14 = vcmp.gt.f32.partialorder %v3684_v50, 0.0  ;;  %v805_v52 = vmul.f32 0.01, %v3684_v50  ;;  %v3206_v53 = vpop.f32.mrb[10].mxu1 }
 0x4eb   :  { %v3685_v54 = vadd.f32 %v3206_v53, %v2855_v46  ;;  %v788_v55 = vpop.f32.mrb[11].mxu1  ;;  %v810_v56 = vsel %vm802_vm13, %v3683_v48, %v806_v51  ;;  %vm1825_vm13 = vcmask 130048  }
 0x4ec   :  { %v3686_v57 = vadd.f32 %v2855_v46, %v788_v55  ;;  %v809_v58 = vsel %vm801_vm14, %v3684_v50, %v805_v52  ;;  %v2877_v46 = vld [vmem:[%s4361_s1 + $0x128] ss:$0 sm:$0xff] }
 0x4ed   :  { %vm804_vm15 = vcmp.gt.f32.partialorder %v3685_v54, 0.0  ;;  %v808_v59 = vmul.f32 0.01, %v3685_v54  ;;  %v3540_v60 = vpack.c.bf16 %v810_v56, %v809_v58 }
 0x4ee   :  { %vm803_vm1 = vcmp.gt.f32.partialorder %v3686_v57, 0.0  ;;  %v807_v61 = vmul.f32 0.01, %v3686_v57 }
 0x4ef   :  { %3541 = vmatprep.subr.bf16.mxu0 %v3540_v60  ;;  %v812_v2 = vsel %vm804_vm15, %v3685_v54, %v808_v59  ;;  %vm2232_vm15 = vcmask 523264  }
 0x4f0   :  { %3543 = vmatpush3.bf16.msra.mxu0 %v3540_v60  ;;  %v811_v3 = vsel %vm803_vm1, %v3686_v57, %v807_v61 }
 0x4f1   :  { %v3544_v4 = vpack.c.bf16 %v812_v2, %v811_v3 }
 0x4f3   :  { %3545 = vmatprep.subr.bf16.mxu0 %v3544_v4 }
 0x4f4   :  { %3547 = vmatpush3.bf16.msra.mxu0 %v3544_v4  ;;  %v1493_v4 = vld [vmem:[%s4361_s1 + $0x160] sm:$0xff] }
 0x4f5   :  { %3549 = vmatprep.subr.bf16.mxu0 %v3548_v7 }
 0x4f7   :  { %3216 = vmatmul.mubr.msk.f32.vlgmr.msra.gmra.mrb[8].mxu0 %vm75_vm0, %v3799_v6  ;;  %v1007_v6 = vld [vmem:[%s4361_s1 + $0x100] sm:$0xff] }
 0x4f8   :  { %3218 = vmatprep.mubr.msk.f32.mxu0 %vm75_vm0, %v3776_v0  ;;  %3551 = vmatpush3.bf16.msra.mxu0 %v3548_v7  ;;  %v1006_v0 = vld [vmem:[%s4361_s1 + $0xf8] sm:$0xff] }
 0x4f9   :  { %3553 = vmatprep.subr.bf16.mxu0 %v3552_v10  ;;  %v3560_v15 = vpack.c.bf16 %v1007_v6, %v1006_v0 }
 0x4fb   :  { %3219 = vmatmul.mubr.msk.f32.gmra.mrb[10].mxu0 %vm75_vm0, %v3794_v5 }
 0x4fc   :  { %3555 = vmatpush3.bf16.msra.mxu0 %v3552_v10  ;;  %v3590_v10 = vpack.c.bf16 %v1495_v9, %v1494_v8  ;;  %v2062_v9 = vld [vmem:[%s4361_s1 + $0x250] sm:$0xff] }
 0x4fd   :  { %3557 = vmatprep.subr.bf16.mxu0 %v3556_v13 }
 0x5ca   :  { %v3217_v5 = vpop.f32.mrb[8].mxu0 }
 0x5cb   :  { %v879_v14 = vpop.f32.mrb[9].mxu0 }
 0x5cc   :  { %3229 = vmatprep.mubr.msk.f32.mxu0 %vm75_vm0, %v879_v14 }
 0x5cd   :  { %3230 = vmatmul.mubr.msk.f32.vlgmr.msra.gmra.mrb[12].mxu0 %vm75_vm0, %v3217_v5 }
 0x5ce   :  { %v3220_v16 = vpop.f32.mrb[10].mxu0  ;;  %3559 = vmatpush3.bf16.msra.mxu0 %v3556_v13 }
 0x5cf   :  { %v889_v17 = vpop.f32.mrb[11].mxu0  ;;  %3561 = vmatprep.subr.bf16.mxu0 %v3560_v15 }
 0x5d0   :  { %3232 = vmatprep.mubr.msk.f32.mxu0 %vm75_vm0, %v889_v17 }
 0x5d1   :  { %3233 = vmatmul.mubr.msk.f32.gmra.mrb[14].mxu0 %vm75_vm0, %v3220_v16 }
 0x5d2   :  { %3563 = vmatpush3.bf16.msra.mxu0 %v3560_v15  ;;  %3243 = vmatprep.mubr.msk.f32.mxu0 %vm75_vm0, %v809_v58 }
 0x5d3   :  { %3580 = vmatprep.subr.bf16.mxu0 %v3752_v63 }
 0x5d5   :  { %3244 = vmatmul.mubr.msk.f32.vlgmr.msra.gmra.mrb[12].mxu0 %vm75_vm0, %v810_v56 }
 0x5d6   :  { %3246 = vmatprep.mubr.msk.f32.mxu0 %vm75_vm0, %v811_v3  ;;  %v1492_v3 = vld [vmem:[%s4361_s1 + $0x158] sm:$0xff] }
 0x5d7   :  { %v3587_v7 = vpack.c.bf16 %v1493_v4, %v1492_v3  ;;  %v2061_v3 = vld [vmem:[%s4361_s1 + $0x248] sm:$0xff] }
 0x5d9   :  { %3247 = vmatmul.mubr.msk.f32.gmra.mrb[14].mxu0 %vm75_vm0, %v812_v2  ;;  %v3754_v2 = vmov 0.0  }
 0x5da   :  { %3285 = vmatprep.mubr.msk.f32.mxu0 %vm3753_vm10, %v3754_v2 }
 0x6a8   :  { %v3245_v24 = vpop.f32.mrb[12].mxu0 }
 0x6a9   :  { %v3687_v25 = vadd.f32 %v3245_v24, %v2868_v23  ;;  %v1086_v26 = vpop.f32.mrb[13].mxu0  ;;  %v1351_v24 = vld [vmem:[%s4361_s1 + $0x3c8] sm:$0xff] }
 0x6aa   :  { %v3688_v27 = vadd.f32 %v2868_v23, %v1086_v26  ;;  %v1901_v26 = vld [vmem:[%s4361_s1 + $0x208] sm:$0xff] }
 0x6ab   :  { %v1114_v28 = vmul.f32 0.01, %v3687_v25  ;;  %vm1110_vm2 = vcmp.gt.f32.partialorder %v3687_v25, 0.0 }
 0x6ac   :  { %vm1109_vm3 = vcmp.gt.f32.partialorder %v3688_v27, 0.0  ;;  %v1113_v29 = vmul.f32 0.01, %v3688_v27  ;;  %v3248_v30 = vpop.f32.mrb[14].mxu0 }
 0x6ad   :  { %v3689_v31 = vadd.f32 %v3248_v30, %v2868_v23  ;;  %v1096_v32 = vpop.f32.mrb[15].mxu0  ;;  %v1118_v35 = vsel %vm1110_vm2, %v3687_v25, %v1114_v28  ;;  %v1900_v25 = vld [vmem:[%s4361_s1 + $0x200] sm:$0xff]  ;;  %v1903_v30 = vld [vmem:[%s4361_s1 + $0x218] sm:$0xff] }
 0x6ae   :  { %v3690_v33 = vadd.f32 %v2868_v23, %v1096_v32  ;;  %v1117_v34 = vsel %vm1109_vm3, %v3688_v27, %v1113_v29  ;;  %v1350_v23 = vld [vmem:[%s4361_s1 + $0x3c0] sm:$0xff]  ;;  %v1352_v27 = vld [vmem:[%s4361_s1 + $0x3d0] sm:$0xff]  ;;  %v3614_v28 = vpack.c.bf16 %v1901_v26, %v1900_v25  ;;  %v2897_v25 = vld [vmem:[%s4361_s1 + $0x1b8] ss:$0 sm:$0xff] }
 0x6af   :  { %v1116_v36 = vmul.f32 0.01, %v3689_v31  ;;  %3257 = vmatprep.mubr.msk.f32.mxu1 %vm75_vm0, %v1117_v34  ;;  %vm1112_vm4 = vcmp.gt.f32.partialorder %v3689_v31, 0.0  ;;  %v1902_v29 = vld [vmem:[%s4361_s1 + $0x210] sm:$0xff]  ;;  %v1575_v34 = vld [vmem:[%s4361_s1 + $0x180] sm:$0xff] }
 0x6b0   :  { %vm1111_vm5 = vcmp.gt.f32.partialorder %v3690_v33, 0.0  ;;  %v1115_v37 = vmul.f32 0.01, %v3690_v33  ;;  %3258 = vmatmul.mubr.msk.f32.vlgmr.msra.gmra.mrb[12].mxu1 %vm75_vm0, %v1118_v35  ;;  %v3617_v32 = vpack.c.bf16 %v1903_v30, %v1902_v29 }
 0x6b1   :  { %v1120_v39 = vsel %vm1112_vm4, %v3689_v31, %v1116_v36  ;;  %3575 = vmatpush3.bf16.msra.mxu1 %v3572_v42  ;;  %v1353_v31 = vld [vmem:[%s4361_s1 + $0x3d8] sm:$0xff]  ;;  %v1576_v36 = vld [vmem:[%s4361_s1 + $0x188] sm:$0xff]  ;;  %v1653_v42 = vld [vmem:[%s4361_s1 + $0x1a0] sm:$0xff]  ;;  %vm2811_vm4 = vcmask 7168  }
 0x6b2   :  { %v1119_v38 = vsel %vm1111_vm5, %v3690_v33, %v1115_v37  ;;  %3577 = vmatprep.subr.bf16.mxu1 %v3576_v45  ;;  %v1574_v33 = vld [vmem:[%s4361_s1 + $0x178] sm:$0xff]  ;;  %v1577_v37 = vld [vmem:[%s4361_s1 + $0x190] sm:$0xff]  ;;  %vm2813_vm5 = vcmask 15360  }
 0x6b3   :  { %3260 = vmatprep.mubr.msk.f32.mxu1 %vm75_vm0, %v1119_v38  ;;  %v3593_v35 = vpack.c.bf16 %v1575_v34, %v1574_v33  ;;  %v3596_v40 = vpack.c.bf16 %v1577_v37, %v1576_v36  ;;  %v1818_v33 = vld [vmem:[%s4361_s1 + $0x1e8] sm:$0xff]  ;;  %v1819_v34 = vld [vmem:[%s4361_s1 + $0x1f0] sm:$0xff]  ;;  %v2900_v36 = vld [vmem:[%s4361_s1 + $0x1e0] ss:$0 sm:$0xff] }
 0x6b4   :  { %3261 = vmatmul.mubr.msk.f32.gmra.mrb[14].mxu1 %vm75_vm0, %v1120_v39 }
 0x6b5   :  { %3579 = vmatpush3.bf16.msra.mxu1 %v3576_v45  ;;  %v3599_v45 = vpack.c.bf16 %v1653_v42, %v1652_v41 }
 0x6b6   :  { %3586 = vmatprep.subr.bf16.mxu1 %v3752_v63 }
 0x783   :  { %v3259_v47 = vpop.f32.mrb[12].mxu1 }
 0x784   :  { %v1214_v48 = vadd.f32 %v3259_v47, %v2877_v46  ;;  %v1208_v49 = vpop.f32.mrb[13].mxu1  ;;  %v1655_v47 = vld [vmem:[%s4361_s1 + $0x1b0] sm:$0xff] }
 0x785   :  { %v1209_v50 = vadd.f32 %v2877_v46, %v1208_v49  ;;  %v1983_v49 = vld [vmem:[%s4361_s1 + $0x228] sm:$0xff] }
 0x786   :  { %v1232_v51 = vmul.f32 0.01, %v1214_v48  ;;  %vm1228_vm6 = vcmp.gt.f32.partialorder %v1214_v48, 0.0 }
 0x787   :  { %vm1227_vm7 = vcmp.gt.f32.partialorder %v1209_v50, 0.0  ;;  %v1231_v52 = vmul.f32 0.01, %v1209_v50  ;;  %v3262_v53 = vpop.f32.mrb[14].mxu1 }
 0x788   :  { %v1224_v54 = vadd.f32 %v3262_v53, %v2877_v46  ;;  %v1218_v55 = vpop.f32.mrb[15].mxu1  ;;  %v1236_v58 = vsel %vm1228_vm6, %v1214_v48, %v1232_v51  ;;  %v1982_v48 = vld [vmem:[%s4361_s1 + $0x220] sm:$0xff]  ;;  %vm2815_vm6 = vcmask 17408  }
 0x789   :  { %v1219_v56 = vadd.f32 %v2877_v46, %v1218_v55  ;;  %v1235_v57 = vsel %vm1227_vm7, %v1209_v50, %v1231_v52  ;;  %v1654_v46 = vld [vmem:[%s4361_s1 + $0x1a8] sm:$0xff]  ;;  %v3620_v53 = vpack.c.bf16 %v1983_v49, %v1982_v48  ;;  %v1985_v55 = vld [vmem:[%s4361_s1 + $0x238] sm:$0xff]  ;;  %v2224_v49 = vld [vmem:[%s4361_s1 + $0x2b0] sm:$0xff] }
 0x78a   :  { %v1234_v59 = vmul.f32 0.01, %v1224_v54  ;;  %3271 = vmatprep.mubr.msk.f32.mxu1 %vm75_vm0, %v1235_v57  ;;  %vm1230_vm8 = vcmp.gt.f32.partialorder %v1224_v54, 0.0  ;;  %v3602_v52 = vpack.c.bf16 %v1655_v47, %v1654_v46  ;;  %v1734_v57 = vld [vmem:[%s4361_s1 + $0x1c8] sm:$0xff] }
 0x78b   :  { %vm1229_vm9 = vcmp.gt.f32.partialorder %v1219_v56, 0.0  ;;  %v1233_v60 = vmul.f32 0.01, %v1219_v56  ;;  %3272 = vmatmul.mubr.msk.f32.vlgmr.msra.gmra.mrb[16].mxu1 %vm75_vm0, %v1236_v58  ;;  %v2223_v48 = vld [vmem:[%s4361_s1 + $0x2a8] sm:$0xff] }
 0x78c   :  { %v1238_v62 = vsel %vm1230_vm8, %v1224_v54, %v1234_v59  ;;  %3588 = vmatpush3.bf16.msra.mxu1 %v3587_v7  ;;  %v1984_v54 = vld [vmem:[%s4361_s1 + $0x230] sm:$0xff] }
 0x78d   :  { %v1237_v61 = vsel %vm1229_vm9, %v1219_v56, %v1233_v60  ;;  %3589 = vmatprep.subr.bf16.mxu1 %v3752_v63  ;;  %v1733_v56 = vld [vmem:[%s4361_s1 + $0x1c0] sm:$0xff]  ;;  %v3623_v60 = vpack.c.bf16 %v1985_v55, %v1984_v54 }
 0x78e   :  { %3274 = vmatprep.mubr.msk.f32.mxu1 %vm75_vm0, %v1237_v61  ;;  %v3605_v61 = vpack.c.bf16 %v1734_v57, %v1733_v56 }
 0x78f   :  { %3275 = vmatmul.mubr.msk.f32.gmra.mrb[18].mxu1 %vm75_vm0, %v1238_v62  ;;  %v2060_v62 = vld [vmem:[%s4361_s1 + $0x240] sm:$0xff] }
 0x790   :  { %3320 = vmatprep.mubr.msk.f32.mxu1 %vm3753_vm10, %v3754_v2  ;;  %3591 = vmatpush3.bf16.msra.mxu1 %v3590_v10  ;;  %v3626_v8 = vpack.c.bf16 %v2061_v3, %v2060_v62  ;;  %v2063_v10 = vld [vmem:[%s4361_s1 + $0x258] sm:$0xff]  ;;  %v2312_v62 = vld [vmem:[%s4361_s1 + $0x2e8] sm:$0xff] }
 0x791   :  { %3592 = vmatprep.subr.bf16.mxu1 %v3752_v63 }
 0x85e   :  { %v3273_v12 = vpop.f32.mrb[16].mxu1 }
 0x85f   :  { %v1332_v13 = vadd.f32 %v3273_v12, %v2882_v11  ;;  %v1326_v0 = vpop.f32.mrb[17].mxu1  ;;  %v2138_v12 = vld [vmem:[%s4361_s1 + $0x260] sm:$0xff] }
 0x860   :  { %v1327_v6 = vadd.f32 %v2882_v11, %v1326_v0 }
 0x862   :  { %v3581_v5 = vpack.c.bf16 %v1332_v13, %v1327_v6  ;;  %v3276_v14 = vpop.f32.mrb[18].mxu1  ;;  %v2139_v13 = vld [vmem:[%s4361_s1 + $0x268] sm:$0xff]  ;;  %v2140_v6 = vld [vmem:[%s4361_s1 + $0x270] sm:$0xff] }
 0x863   :  { %v1342_v15 = vadd.f32 %v3276_v14, %v2882_v11  ;;  %v1336_v16 = vpop.f32.mrb[19].mxu1  ;;  %v3632_v0 = vpack.c.bf16 %v2139_v13, %v2138_v12 }
 0x864   :  { %v1337_v17 = vadd.f32 %v2882_v11, %v1336_v16  ;;  %3582 = vmatpush3.bf16.msra.mxu0 %v3581_v5  ;;  %v3629_v11 = vpack.c.bf16 %v2063_v10, %v2062_v9  ;;  %v2141_v5 = vld [vmem:[%s4361_s1 + $0x278] sm:$0xff] }
 0x865   :  { %3583 = vmatprep.subr.bf16.mxu0 %v3752_v63  ;;  %v3635_v16 = vpack.c.bf16 %v2141_v5, %v2140_v6  ;;  %v2395_v6 = vld [vmem:[%s4361_s1 + $0x300] sm:$0xff] }
 0x866   :  { %v3584_v18 = vpack.c.bf16 %v1342_v15, %v1337_v17 }
 0x868   :  { %3585 = vmatpush3.bf16.msra.mxu0 %v3584_v18 }
 0x869   :  { %3613 = vmatprep.subr.bf16.mxu0 %v3752_v63 }
 0x86b   :  { %3286 = vmatmul.mubr.msk.f32.vlgmr.msra.gmra.mrb[16].mxu0 %vm75_vm0, %v1345_v19  ;;  %v1735_v19 = vld [vmem:[%s4361_s1 + $0x1d0] sm:$0xff] }
 0x86c   :  { %3288 = vmatprep.mubr.msk.f32.mxu0 %vm3753_vm10, %v3754_v2  ;;  %3615 = vmatpush3.bf16.msra.mxu0 %v3614_v28 }
 0x86d   :  { %3616 = vmatprep.subr.bf16.mxu0 %v3752_v63 }
 0x86f   :  { %3289 = vmatmul.mubr.msk.f32.gmra.mrb[18].mxu0 %vm75_vm0, %v1346_v20  ;;  %v1736_v20 = vld [vmem:[%s4361_s1 + $0x1d8] sm:$0xff] }
 0x870   :  { %3291 = vmatprep.mubr.msk.f32.mxu0 %vm3753_vm10, %v3754_v2  ;;  %3618 = vmatpush3.bf16.msra.mxu0 %v3617_v32 }
 0x871   :  { %3619 = vmatprep.subr.bf16.mxu0 %v3752_v63 }
 0x873   :  { %3292 = vmatmul.mubr.msk.f32.gmra.mrb[20].mxu0 %vm75_vm0, %v1347_v21  ;;  %v3608_v21 = vpack.c.bf16 %v1736_v20, %v1735_v19 }
 0x874   :  { %3294 = vmatprep.mubr.msk.f32.mxu0 %vm3753_vm10, %v3754_v2 }
 0x877   :  { %3295 = vmatmul.mubr.msk.f32.gmra.mrb[22].mxu0 %vm75_vm0, %v1348_v1 }
 0x878   :  { %3297 = vmatprep.mubr.msk.f32.mxu0 %vm3753_vm10, %v3754_v2 }
 0x87b   :  { %3298 = vmatmul.mubr.msk.f32.gmra.mrb[24].mxu0 %vm75_vm0, %v1349_v22 }
 0x87c   :  { %3300 = vmatprep.mubr.msk.f32.mxu0 %vm3753_vm10, %v3754_v2 }
 0x87f   :  { %3301 = vmatmul.mubr.msk.f32.gmra.mrb[26].mxu0 %vm75_vm0, %v1350_v23 }
 0x880   :  { %3303 = vmatprep.mubr.msk.f32.mxu0 %vm3753_vm10, %v3754_v2 }
 0x883   :  { %3304 = vmatmul.mubr.msk.f32.gmra.mrb[28].mxu0 %vm75_vm0, %v1351_v24 }
 0x884   :  { %3306 = vmatprep.mubr.msk.f32.mxu0 %vm3753_vm10, %v3754_v2 }
 0x887   :  { %3307 = vmatmul.mubr.msk.f32.gmra.mrb[30].mxu0 %vm75_vm0, %v1352_v27 }
 0x888   :  { %3309 = vmatprep.mubr.msk.f32.mxu0 %vm3753_vm10, %v3754_v2 }
 0x88b   :  { %3310 = vmatmul.mubr.msk.f32.gmra.mrb[32].mxu0 %vm75_vm0, %v1353_v31 }
 0x88c   :  { %3371 = vmatprep.mubr.msk.f32.mxu0 %vm3753_vm10, %v3754_v2 }
 0x93e   :  { %v1447_v38 = vpop.f32.mrb[16].mxu0 }
 0x93f   :  { %v3287_v39 = vpop.f32.mrb[17].mxu0  ;;  %3321 = vmatmul.mubr.msk.f32.vlgmr.msra.gmra.mrb[20].mxu1 %vm75_vm0, %v1447_v38  ;;  %v2219_v38 = vld [vmem:[%s4361_s1 + $0x288] sm:$0xff] }
 0x940   :  { %3594 = vmatpush3.bf16.msra.mxu1 %v3593_v35  ;;  %3331 = vmatprep.mubr.msk.f32.mxu1 %vm3753_vm10, %v3754_v2  ;;  %v3611_v35 = vpack.c.bf16 %v1819_v34, %v1818_v33  ;;  %v2220_v39 = vld [vmem:[%s4361_s1 + $0x290] sm:$0xff]  ;;  %v2638_v33 = vld [vmem:[%s4361_s1 + $0x358] sm:$0xff]  ;;  %v2639_v34 = vld [vmem:[%s4361_s1 + $0x360] sm:$0xff] }
 0x941   :  { %3595 = vmatprep.subr.bf16.mxu1 %v3752_v63 }
 0x942   :  { %v1452_v43 = vpop.f32.mrb[18].mxu0 }
 0x943   :  { %v3290_v44 = vpop.f32.mrb[19].mxu0 }
 0x944   :  { %3597 = vmatpush3.bf16.msra.mxu1 %v3596_v40  ;;  %v2221_v44 = vld [vmem:[%s4361_s1 + $0x298] sm:$0xff] }
 0x945   :  { %3598 = vmatprep.subr.bf16.mxu1 %v3752_v63 }
 0x946   :  { %v1457_v50 = vpop.f32.mrb[20].mxu0 }
 0x947   :  { %3332 = vmatmul.mubr.msk.f32.vlgmr.msra.gmra.mrb[20].mxu1 %vm75_vm0, %v1452_v43  ;;  %v3293_v51 = vpop.f32.mrb[21].mxu0  ;;  %v3638_v43 = vpack.c.bf16 %v2220_v39, %v2219_v38 }
 0x948   :  { %3600 = vmatpush3.bf16.msra.mxu1 %v3599_v45  ;;  %3342 = vmatprep.mubr.msk.f32.mxu1 %vm3753_vm10, %v3754_v2  ;;  %v2222_v45 = vld [vmem:[%s4361_s1 + $0x2a0] sm:$0xff]  ;;  %v3644_v51 = vpack.c.bf16 %v2224_v49, %v2223_v48  ;;  %v2918_v49 = vld [vmem:[%s4361_s1 + $0x378] ss:$0 sm:$0xff] }
 0x949   :  { %3601 = vmatprep.subr.bf16.mxu1 %v3752_v63  ;;  %v3641_v47 = vpack.c.bf16 %v2222_v45, %v2221_v44 }
 0x94a   :  { %v1462_v58 = vpop.f32.mrb[22].mxu0 }
 0x94b   :  { %3372 = vmatmul.mubr.msk.f32.vlgmr.msra.gmra.mrb[34].mxu0 %vm75_vm0, %v1462_v58  ;;  %v3296_v59 = vpop.f32.mrb[23].mxu0  ;;  %v2309_v58 = vld [vmem:[%s4361_s1 + $0x2d0] sm:$0xff] }
 0x94c   :  { %3603 = vmatpush3.bf16.msra.mxu1 %v3602_v52  ;;  %3621 = vmatpush3.bf16.msra.mxu0 %v3620_v53  ;;  %v2225_v52 = vld [vmem:[%s4361_s1 + $0x2b8] sm:$0xff]  ;;  %v2226_v53 = vld [vmem:[%s4361_s1 + $0x2c0] sm:$0xff] }
 0x94d   :  { %3622 = vmatprep.subr.bf16.mxu0 %v3752_v63  ;;  %3382 = vmatprep.mubr.msk.f32.mxu0 %vm3753_vm10, %v3754_v2  ;;  %v3647_v55 = vpack.c.bf16 %v2226_v53, %v2225_v52  ;;  %v2310_v59 = vld [vmem:[%s4361_s1 + $0x2d8] sm:$0xff] }
 0x94e   :  { %v1467_v4 = vpop.f32.mrb[24].mxu0  ;;  %3604 = vmatprep.subr.bf16.mxu1 %v3752_v63 }
 0x94f   :  { %3343 = vmatmul.mubr.msk.f32.vlgmr.msra.gmra.mrb[20].mxu1 %vm75_vm0, %v1457_v50  ;;  %v3299_v7 = vpop.f32.mrb[25].mxu0  ;;  %v2905_v50 = vld [vmem:[%s4361_s1 + $0x280] ss:$0 sm:$0xff] }
 0x950   :  { %3624 = vmatpush3.bf16.msra.mxu0 %v3623_v60  ;;  %3606 = vmatpush3.bf16.msra.mxu1 %v3605_v61  ;;  %v3650_v60 = vpack.c.bf16 %v2310_v59, %v2309_v58  ;;  %v2311_v61 = vld [vmem:[%s4361_s1 + $0x2e0] sm:$0xff]  ;;  %v2902_v58 = vld [vmem:[%s4361_s1 + $0x1f8] ss:$0 sm:$0xff] }
 0x951   :  { %3625 = vmatprep.subr.bf16.mxu0 %v3752_v63  ;;  %3607 = vmatprep.subr.bf16.mxu1 %v3752_v63  ;;  %v3653_v3 = vpack.c.bf16 %v2312_v62, %v2311_v61 }
 0x952   :  { %3353 = vmatprep.mubr.msk.f32.mxu1 %vm3753_vm10, %v3754_v2  ;;  %v1472_v14 = vpop.f32.mrb[26].mxu0 }
 0x953   :  { %3383 = vmatmul.mubr.msk.f32.vlgmr.msra.gmra.mrb[34].mxu0 %vm75_vm0, %v1467_v4  ;;  %v3302_v15 = vpop.f32.mrb[27].mxu0 }
 0x954   :  { %3627 = vmatpush3.bf16.msra.mxu0 %v3626_v8  ;;  %3393 = vmatprep.mubr.msk.f32.mxu0 %vm3753_vm10, %v3754_v2  ;;  %v2909_v8 = vld [vmem:[%s4361_s1 + $0x2c8] ss:$0 sm:$0xff] }
 0x955   :  { %3628 = vmatprep.subr.bf16.mxu0 %v3752_v63  ;;  %3609 = vmatpush3.bf16.msra.mxu1 %v3608_v21 }
 0x956   :  { %v1477_v17 = vpop.f32.mrb[28].mxu0  ;;  %3610 = vmatprep.subr.bf16.mxu1 %v3752_v63 }
 0x957   :  { %v3305_v18 = vpop.f32.mrb[29].mxu0 }
 0x958   :  { %3630 = vmatpush3.bf16.msra.mxu0 %v3629_v11 }
 0x959   :  { %3631 = vmatprep.subr.bf16.mxu0 %v3752_v63 }
 0x95a   :  { %v4184_v1 = vpop.f32.mrb[30].mxu0 }
 0x95b   :  { %3394 = vmatmul.mubr.msk.f32.vlgmr.msra.gmra.mrb[34].mxu0 %vm75_vm0, %v1472_v14  ;;  %v3308_v22 = vpop.f32.mrb[31].mxu0  ;;  %v2911_v14 = vld [vmem:[%s4361_s1 + $0x2f0] ss:$0 sm:$0xff] }
 0x95c   :  { %3633 = vmatpush3.bf16.msra.mxu0 %v3632_v0  ;;  %3404 = vmatprep.mubr.msk.f32.mxu0 %vm3753_vm10, %v3754_v2  ;;  %v2394_v0 = vld [vmem:[%s4361_s1 + $0x2f8] sm:$0xff]  ;;  %v2477_v22 = vld [vmem:[%s4361_s1 + $0x320] sm:$0xff] }
 0x95d   :  { %3634 = vmatprep.subr.bf16.mxu0 %v3752_v63  ;;  %v3656_v5 = vpack.c.bf16 %v2395_v6, %v2394_v0 }
 0x95e   :  { %v4186_v23 = vpop.f32.mrb[32].mxu0 }
 0x95f   :  { %v3311_v24 = vpop.f32.mrb[33].mxu0 }
 0x960   :  { %3636 = vmatpush3.bf16.msra.mxu0 %v3635_v16  ;;  %v2475_v16 = vld [vmem:[%s4361_s1 + $0x310] sm:$0xff]  ;;  %v2478_v24 = vld [vmem:[%s4361_s1 + $0x328] sm:$0xff] }
 0x961   :  { %3670 = vmatprep.subr.bf16.mxu0 %v3752_v63 }
 0x963   :  { %3405 = vmatmul.mubr.msk.f32.vlgmr.msra.gmra.mrb[34].mxu0 %vm75_vm0, %v1477_v17  ;;  %v2476_v17 = vld [vmem:[%s4361_s1 + $0x318] sm:$0xff] }
 0x964   :  { %3474 = vmatprep.mubr.msk.f32.mxu0 %vm3753_vm10, %v3754_v2  ;;  %v3659_v21 = vpack.c.bf16 %v2476_v17, %v2475_v16 }
 0xa22   :  { %v1725_v26 = vpop.f32.mrb[20].mxu1 }
 0xa23   :  { %v3691_v27 = vadd.f32 %v2897_v25, %v1725_v26  ;;  %v3344_v28 = vpop.f32.mrb[21].mxu1  ;;  %v3662_v26 = vpack.c.bf16 %v2478_v24, %v2477_v22 }
 0xa24   :  { %v2558_v28 = vld [vmem:[%s4361_s1 + $0x338] sm:$0xff] }
 0xa25   :  { %vm1730_vm11 = vcmp.gt.f32.partialorder %v3691_v27, 0.0  ;;  %v1731_v29 = vmul.f32 0.01, %v3691_v27 }
 0xa27   :  { %v1732_v30 = vsel %vm1730_vm11, %v3691_v27, %v1731_v29  ;;  %v2557_v27 = vld [vmem:[%s4361_s1 + $0x330] sm:$0xff] }
 0xa28   :  { %3354 = vmatmul.mubr.msk.f32.vlgmr.msra.gmra.mrb[22].mxu1 %vm75_vm0, %v1732_v30  ;;  %v3665_v29 = vpack.c.bf16 %v2558_v28, %v2557_v27  ;;  %v2559_v30 = vld [vmem:[%s4361_s1 + $0x340] sm:$0xff] }
 0xa29   :  { %3360 = vmatprep.mubr.msk.f32.mxu1 %vm3753_vm10, %v3754_v2  ;;  %3612 = vmatpush3.bf16.msra.mxu1 %v3611_v35  ;;  %v2640_v35 = vld [vmem:[%s4361_s1 + $0x368] sm:$0xff] }
 0xa2a   :  { %3637 = vmatprep.subr.bf16.mxu1 %v3752_v63 }
 0xa36   :  { %v2211_v31 = vpop.f32.mrb[34].mxu0 }
 0xa37   :  { %v3406_v32 = vpop.f32.mrb[35].mxu0  ;;  %v3692_v54 = vadd.f32 %v2905_v50, %v2211_v31  ;;  %v2560_v31 = vld [vmem:[%s4361_s1 + $0x348] sm:$0xff] }
 0xa38   :  { %v3668_v32 = vpack.c.bf16 %v2560_v31, %v2559_v30 }
 0xa39   :  { %v2217_v56 = vmul.f32 0.01, %v3692_v54  ;;  %vm2216_vm14 = vcmp.gt.f32.partialorder %v3692_v54, 0.0 }
 0xa3b   :  { %v2218_v57 = vsel %vm2216_vm14, %v3692_v54, %v2217_v56  ;;  %v2920_v54 = vld [vmem:[%s4361_s1 + $0x390] ss:$0 sm:$0xff] }
 0xafb   :  { %v1811_v37 = vpop.f32.mrb[22].mxu1 }
 0xafc   :  { %v1812_v40 = vadd.f32 %v2900_v36, %v1811_v37  ;;  %v3355_v41 = vpop.f32.mrb[23].mxu1  ;;  %v2913_v37 = vld [vmem:[%s4361_s1 + $0x308] ss:$0 sm:$0xff] }
 0xafd   :  { %v2916_v41 = vld [vmem:[%s4361_s1 + $0x350] ss:$0 sm:$0xff] }
 0xafe   :  { %vm1815_vm12 = vcmp.gt.f32.partialorder %v1812_v40, 0.0  ;;  %v1816_v42 = vmul.f32 0.01, %v1812_v40 }
 0xb00   :  { %v1817_v46 = vsel %vm1815_vm12, %v1812_v40, %v1816_v42 }
 0xb01   :  { %3361 = vmatmul.mubr.msk.f32.vlgmr.msra.gmra.mrb[24].mxu1 %vm1825_vm13, %v1817_v46 }
 0xb02   :  { %3639 = vmatpush3.bf16.msra.mxu1 %v3638_v43  ;;  %3423 = vmatprep.mubr.msk.f32.mxu1 %vm3753_vm10, %v3754_v2 }
 0xb03   :  { %3640 = vmatprep.subr.bf16.mxu1 %v3752_v63 }
 0xb06   :  { %3642 = vmatpush3.bf16.msra.mxu1 %v3641_v47  ;;  %v2724_v47 = vld [vmem:[%s4361_s1 + $0x388] sm:$0xff] }
 0xb07   :  { %3643 = vmatprep.subr.bf16.mxu1 %v3752_v63 }
 0xb0a   :  { %3645 = vmatpush3.bf16.msra.mxu1 %v3644_v51 }
 0xb0b   :  { %3646 = vmatprep.subr.bf16.mxu1 %v3752_v63 }
 0xb0e   :  { %3648 = vmatpush3.bf16.msra.mxu1 %v3647_v55 }
 0xb0f   :  { %3649 = vmatprep.subr.bf16.mxu1 %v3752_v63 }
 0xb11   :  { %3424 = vmatmul.mubr.msk.f32.vlgmr.msra.gmra.mrb[26].mxu1 %vm2232_vm15, %v2218_v57 }
 0xb12   :  { %3434 = vmatprep.mubr.msk.f32.mxu1 %vm3753_vm10, %v3754_v2  ;;  %3651 = vmatpush3.bf16.msra.mxu1 %v3650_v60 }
 0xb13   :  { %3652 = vmatprep.subr.bf16.mxu1 %v3752_v63 }
 0xb16   :  { %3654 = vmatpush3.bf16.msra.mxu1 %v3653_v3 }
 0xb17   :  { %3655 = vmatprep.subr.bf16.mxu1 %v3752_v63 }
 0xbd4   :  { %v4254_v4 = vpop.f32.mrb[24].mxu1 }
 0xbd5   :  { %v3362_v7 = vpop.f32.mrb[25].mxu1  ;;  %v1896_v60 = vadd.f32 %v2902_v58, %v4254_v4 }
 0xbe4   :  { %v2302_v9 = vpop.f32.mrb[26].mxu1 }
 0xbe5   :  { %v2303_v10 = vadd.f32 %v2909_v8, %v2302_v9  ;;  %v3425_v11 = vpop.f32.mrb[27].mxu1 }
 0xbe7   :  { %vm2306_vm1 = vcmp.gt.f32.partialorder %v2303_v10, 0.0  ;;  %v2307_v12 = vmul.f32 0.01, %v2303_v10 }
 0xbe9   :  { %v2308_v13 = vsel %vm2306_vm1, %v2303_v10, %v2307_v12 }
 0xbea   :  { %3435 = vmatmul.mubr.msk.f32.vlgmr.msra.gmra.mrb[28].mxu1 %vm75_vm0, %v2308_v13 }
 0xbeb   :  { %3441 = vmatprep.mubr.msk.f32.mxu1 %vm3753_vm10, %v3754_v2  ;;  %3657 = vmatpush3.bf16.msra.mxu1 %v3656_v5 }
 0xbec   :  { %3658 = vmatprep.subr.bf16.mxu1 %v3752_v63 }
 0xcbd   :  { %v2387_v15 = vpop.f32.mrb[28].mxu1 }
 0xcbe   :  { %v2388_v18 = vadd.f32 %v2911_v14, %v2387_v15  ;;  %v3436_v19 = vpop.f32.mrb[29].mxu1 }
 0xcc0   :  { %vm2391_vm2 = vcmp.gt.f32.partialorder %v2388_v18, 0.0  ;;  %v2392_v20 = vmul.f32 0.01, %v2388_v18 }
 0xcc2   :  { %v2393_v25 = vsel %vm2391_vm2, %v2388_v18, %v2392_v20 }
 0xcc3   :  { %3442 = vmatmul.mubr.msk.f32.vlgmr.msra.gmra.mrb[30].mxu1 %vm1825_vm13, %v2393_v25 }
 0xcc4   :  { %3660 = vmatpush3.bf16.msra.mxu1 %v3659_v21  ;;  %3452 = vmatprep.mubr.msk.f32.mxu1 %vm3753_vm10, %v3754_v2 }
 0xcc5   :  { %3661 = vmatprep.subr.bf16.mxu1 %v3752_v63 }
 0xcc8   :  { %3663 = vmatpush3.bf16.msra.mxu1 %v3662_v26 }
 0xcc9   :  { %3664 = vmatprep.subr.bf16.mxu1 %v3752_v63 }
 0xccb   :  { %3453 = vmatmul.mubr.msk.f32.vlgmr.msra.gmra.mrb[32].mxu1 %vm75_vm0, %v4184_v1  ;;  %v3671_v1 = vpack.c.bf16 %v2639_v34, %v2638_v33 }
 0xccc   :  { %3666 = vmatpush3.bf16.msra.mxu1 %v3665_v29  ;;  %3463 = vmatprep.mubr.msk.f32.mxu1 %vm3753_vm10, %v3754_v2 }
 0xccd   :  { %3667 = vmatprep.subr.bf16.mxu1 %v3752_v63  ;;  %3672 = vmatpush3.bf16.msra.mxu0 %v3671_v1 }
 0xcce   :  { %3673 = vmatprep.subr.bf16.mxu0 %v3752_v63 }
 0xcd0   :  { %3669 = vmatpush3.bf16.msra.mxu1 %v3668_v32 }
 0xcd3   :  { %3464 = vmatmul.mubr.msk.f32.vlgmr.msra.gmra.mrb[32].mxu1 %vm75_vm0, %v4186_v23  ;;  %v2641_v23 = vld [vmem:[%s4361_s1 + $0x370] sm:$0xff] }
 0xcd4   :  { %v3674_v36 = vpack.c.bf16 %v2641_v23, %v2640_v35 }
 0xcd6   :  { %3675 = vmatpush3.bf16.msra.mxu0 %v3674_v36 }
 0xcd7   :  { %3676 = vmatprep.subr.bf16.mxu0 %v3752_v63  ;;  %v2723_v63 = vld [vmem:[%s4361_s1 + $0x380] sm:$0xff] }
 0xcd8   :  { %v3677_v48 = vpack.c.bf16 %v2724_v47, %v2723_v63 }
 0xd96   :  { %v2470_v38 = vpop.f32.mrb[30].mxu1 }
 0xd97   :  { %v2471_v39 = vadd.f32 %v2913_v37, %v2470_v38  ;;  %v3443_v40 = vpop.f32.mrb[31].mxu1 }
 0xd99   :  { %2804 = vrot.lane.b32.xlu0 %v2471_v39, %s3755_s23 }
 0xda6   :  { %v2630_v42 = vpop.f32.mrb[32].mxu1 }
 0xda7   :  { %v3693_v43 = vadd.f32 %v2916_v41, %v2630_v42  ;;  %v3465_v44 = vpop.f32.mrb[33].mxu1 }
 0xda9   :  { %vm2635_vm3 = vcmp.gt.f32.partialorder %v3693_v43, 0.0  ;;  %v2636_v45 = vmul.f32 0.01, %v3693_v43 }
 0xdab   :  { %v2637_v46 = vsel %vm2635_vm3, %v3693_v43, %v2636_v45 }
 0xdac   :  { %3475 = vmatmul.mubr.msk.f32.vlgmr.msra.gmra.mrb[36].mxu0 %vm75_vm0, %v2637_v46 }
 0xdad   :  { %3481 = vmatprep.mubr.msk.f32.mxu0 %vm3753_vm10, %v3754_v2  ;;  %3678 = vmatpush3.bf16.msra.mxu0 %v3677_v48 }
 0xe0b   :  { %v2805_v59 = vpop.permute.xlu0 %2804 }
 0xe0c   :  { %v2812_v61 = vsel %vm2811_vm4, %v1896_v60, %v2805_v59 }
 0xe7f   :  { %v2716_v50 = vpop.f32.mrb[36].mxu0 }
 0xe80   :  { %v2717_v51 = vadd.f32 %v2918_v49, %v2716_v50  ;;  %v3476_v52 = vpop.f32.mrb[37].mxu0 }
 0xe82   :  { %vm2720_vm0 = vcmp.gt.f32.partialorder %v2717_v51, 0.0  ;;  %v2721_v53 = vmul.f32 0.01, %v2717_v51 }
 0xe84   :  { %v2722_v2 = vsel %vm2720_vm0, %v2717_v51, %v2721_v53 }
 0xe85   :  { %3482 = vmatmul.mubr.msk.f32.vlgmr.msra.gmra.mrb[38].mxu0 %vm1825_vm13, %v2722_v2 }
 0xf58   :  { %v2799_v55 = vpop.f32.mrb[38].mxu0 }
 0xf59   :  { %v2800_v56 = vadd.f32 %v2920_v54, %v2799_v55  ;;  %v3483_v57 = vpop.f32.mrb[39].mxu0 }
 0xf5b   :  { %2808 = vrot.lane.b32.xlu1 %v2800_v56, %s3756_s5 }
 0xfcd   :  { %v2809_v62 = vpop.permute.xlu1 %2808 }
 0xfce   :  { %v2814_v3 = vsel %vm2813_vm5, %v2812_v61, %v2809_v62 }
 0xfcf   :  { %2816 = vst.msk [vmem:[#allocation2] sm:$0x3] %vm2815_vm6, %v2814_v3 }
 0xfd0   :  { %3738 = shalt.err (!%p3735_p4)
}
 0xfd1   :  { %s3739_s12 = scalar_lea.hbm %s4362_s2, 32 }
 0xfd2   :  { %p3740_p5 = scmp.ne.s32.totalorder %s4362_s2, %s3739_s12  ;;  %p3743_p6 = scmp.lt.u32.totalorder %s3739_s12, %s4362_s2 }
 0xfd4   :  { %p3745_p7 = pnand %p3743_p6, %p3740_p5 }
 0xfd6   :  { %3748 = shalt.err (!%p3745_p7)
}
 0xfd7   :  { %2826 = dma.vmem_to_hbm [thread:$0]  %s2824_s9, 32, %s4362_s2, [#allocation3]  }
 0xfd8   :  { %3749 = dma.done.wait [#allocation3], 32  }
 0xfd9   :  { %3750 = vsyncadd [#allocation3], 4294967264 }
 0xfda   :  { %2830 = vsyncpa [#allocation3], 1 }

</bundles_post_ra>
